<compile_context>
chip_gen: v5e
topology: v5e:2x2
jax: 0.10.0
libtpu: 0.0.40
codegen_flags: <defaults>
</compile_context>

<pallas_src>
import functools

import jax
import jax.numpy as jnp
from jax import lax
from jax.experimental import pallas as pl
from jax.experimental.pallas import tpu as pltpu

EPS = 1e-8


# ----------------------------- sizing helpers --------------------------------
@functools.lru_cache(maxsize=None)
def _tpu_hw():
    """(physical VMEM bytes per core, TensorCores per chip) with safe fallbacks."""
    vmem = 64 << 20                      # conservative default (v7x per-TC VMEM)
    try:
        info = pltpu.get_tpu_info()
        vmem = int(getattr(info, "vmem_capacity_bytes", vmem))
    except Exception:
        pass
    # v5e / v6e: single TensorCore, 128 MiB VMEM.  v7x: 2 TCs @ 64 MiB each.
    cores = 1 if vmem > (96 << 20) else 2
    return vmem, cores


def _block_budget_bytes(phys_vmem):
    """Single-copy per-grid-step block budget (Pallas double-buffers on top)."""
    return (40 << 20) if phys_vmem > (96 << 20) else (22 << 20)


def _vmem_limit_bytes(block_bytes, phys_vmem):
    """2x (double buffering) + ~25% headroom, capped well below physical VMEM."""
    cap = (96 << 20) if phys_vmem > (96 << 20) else (48 << 20)
    need = int(2.5 * block_bytes)
    return int(min(cap, max(need, 32 << 20)))


def _pick_block_batch(batch, bytes_per_batch, budget_bytes, num_cores):
    """Largest batch block fitting the budget and dividing the batch exactly.
    Only forces >= 2 grid steps on multi-TensorCore chips (megacore sharding)."""
    bb = max(1, budget_bytes // max(1, bytes_per_batch))
    if num_cores > 1 and batch >= 2:
        bb = min(bb, batch // 2)
    bb = max(1, min(bb, batch))
    while batch % bb:
        bb -= 1
    return max(1, bb)


# ----------------------------- fused kernel ----------------------------------
def _readhead_kernel(w_ref, wcol_ref, r_ref, L_ref, p_ref, mem_ref, key_ref,
                     gate_ref, Lnew_ref, pnew_ref, rw_ref, rv_ref):
    n = L_ref.shape[-1]
    n_reads = r_ref.shape[1]
    cell_w = mem_ref.shape[-1]

    # ---- temporal memory linkage (link update uses OLD precedence) ----
    w = w_ref[...]                        # (BB, 1, N)  wt_j
    w_col = wcol_ref[...]                 # (BB, N, 1)  wt_i (pre-reshaped in wrapper)
    p = p_ref[...]                        # (BB, 1, N)  pt_j

    # off-diagonal mask built in-kernel and fused via a single select.
    row = lax.broadcasted_iota(jnp.int32, (n, n), 0)
    col = lax.broadcasted_iota(jnp.int32, (n, n), 1)
    off_diag = (row != col)[None, :, :]

    Lnew_ref[...] = jnp.where(
        off_diag, (1.0 - w_col - w) * L_ref[...] + w_col * p, 0.0
    ).astype(Lnew_ref.dtype)
    pnew_ref[...] = ((1.0 - jnp.sum(w, axis=-1, keepdims=True)) * p
                     + w).astype(pnew_ref.dtype)

    # forward / backward weightings from the UPDATED link matrix (batched MXU).
    r = r_ref[...]                        # (BB, R, N)
    L_new = Lnew_ref[...]                 # reload from VMEM (bounds live range)
    fwd = jnp.einsum('brj,bij->bri', r, L_new,
                     preferred_element_type=jnp.float32)          # (BB, R, N)
    bwd = jnp.einsum('bri,bij->brj', r, L_new,
                     preferred_element_type=jnp.float32)          # (BB, R, N)

    # ---- content addressing (cosine similarity + softmax, no mask) ----
    mem = mem_ref[...]                    # (BB, N, W)
    keys = key_ref[...]                   # (BB, R, W)
    dots = jnp.einsum('brw,bnw->brn', keys, mem,
                      preferred_element_type=jnp.float32)         # (BB, R, N)
    key_norm = jnp.sqrt(jnp.sum(keys * keys, axis=-1, keepdims=True))  # (BB,R,1)
    mem_norm = jnp.sqrt(jnp.sum(mem * mem, axis=-1))                   # (BB,N)

    g = gate_ref[...]                     # (BB, R, 4) = [beta, g_fwd, g_bwd, g_cnt]
    beta = g[:, :, 0:1]
    scores = dots / (key_norm * mem_norm[:, None, :] + EPS) * beta
    scores = scores - jnp.max(scores, axis=-1, keepdims=True)
    exps = jnp.exp(scores)
    content = exps / jnp.sum(exps, axis=-1, keepdims=True)

    # ---- mode-gated read weights and read vector ----
    rw = g[:, :, 1:2] * fwd + g[:, :, 2:3] * bwd + g[:, :, 3:4] * content
    rw_ref[...] = rw.astype(rw_ref.dtype)

    rv = jnp.einsum('brn,bnw->brw', rw, mem,
                    preferred_element_type=jnp.float32)           # (BB, R, W)
    # Read vector is presented lane-dense as (BB, 1, R*W); write one head at a
    # time into its lane window (dense block -> dense HBM writeback).
    for h in range(n_reads):
        rv_ref[:, :, h * cell_w:(h + 1) * cell_w] = (
            rv[:, h:h + 1, :].astype(rv_ref.dtype))


def _readhead_fused(memory, keys, gate_pack, write_weights, prev_read,
                    links, precedence):
    """One fused ReadHead step on (B, N, W) memory.  links (B,N,N) and
    precedence (B,1,N) are recurrent state and are updated in place."""
    B, N, W = memory.shape
    R = keys.shape[1]
    phys_vmem, n_cores = _tpu_hw()

    per_batch_bytes = 4 * (2 * N * N + 2 * R * N + N * W + 2 * R * W
                           + 4 * N + 4 * R)
    BB = _pick_block_batch(B, per_batch_bytes, _block_budget_bytes(phys_vmem),
                           n_cores)
    grid = (B // BB,)

    w_row = write_weights.reshape(B, 1, N)
    w_col = write_weights.reshape(B, N, 1)   # avoids in-kernel transpose

    in_specs = [
        pl.BlockSpec((BB, 1, N), lambda b: (b, 0, 0)),      # write weights (row)
        pl.BlockSpec((BB, N, 1), lambda b: (b, 0, 0)),      # write weights (col)
        pl.BlockSpec((BB, R, N), lambda b: (b, 0, 0)),      # prev read weights
        pl.BlockSpec((BB, N, N), lambda b: (b, 0, 0)),      # links (aliased out 0)
        pl.BlockSpec((BB, 1, N), lambda b: (b, 0, 0)),      # precedence (aliased out 1)
        pl.BlockSpec((BB, N, W), lambda b: (b, 0, 0)),      # memory
        pl.BlockSpec((BB, R, W), lambda b: (b, 0, 0)),      # keys
        pl.BlockSpec((BB, R, 4), lambda b: (b, 0, 0)),      # packed [beta,gf,gb,gc]
    ]
    out_specs = [
        pl.BlockSpec((BB, N, N), lambda b: (b, 0, 0)),      # new links
        pl.BlockSpec((BB, 1, N), lambda b: (b, 0, 0)),      # new precedence
        pl.BlockSpec((BB, R, N), lambda b: (b, 0, 0)),      # read weights
        pl.BlockSpec((BB, 1, R * W), lambda b: (b, 0, 0)),  # read vector (lane-dense)
    ]
    out_shapes = (
        jax.ShapeDtypeStruct((B, N, N), jnp.float32),
        jax.ShapeDtypeStruct((B, 1, N), jnp.float32),
        jax.ShapeDtypeStruct((B, R, N), jnp.float32),
        jax.ShapeDtypeStruct((B, 1, R * W), jnp.float32),
    )
    new_links, new_prec, read_w, rv_flat = pl.pallas_call(
        _readhead_kernel,
        out_shape=out_shapes,
        grid_spec=pltpu.PrefetchScalarGridSpec(
            num_scalar_prefetch=0, grid=grid,
            in_specs=in_specs, out_specs=out_specs),
        input_output_aliases={3: 0, 4: 1},                  # links / precedence in place
        compiler_params=pltpu.CompilerParams(
            dimension_semantics=("parallel",),
            vmem_limit_bytes=_vmem_limit_bytes(BB * per_batch_bytes, phys_vmem)),
    )(w_row, w_col, prev_read, links, precedence, memory, keys, gate_pack)

    return read_w, rv_flat.reshape(B, R, W), new_links, new_prec


# ------------------------------ full step -------------------------------------
@functools.partial(jax.jit, donate_argnums=(4, 5))
def _readhead_step(memory, controls, write_weights, prev_read_weights,
                   links, precedence):
    """One ReadHead.forward step (masking=False, links=True, sharpening=False)."""
    B, N, W = memory.shape
    R = prev_read_weights.shape[1]
    controls = controls.astype(jnp.float32)
    memory = memory.astype(jnp.float32)
    write_weights = write_weights.astype(jnp.float32)

    # split_tensor(controls, [[R, W], R, [R, 3]]) + the module's nonlinearities
    pos = 0
    keys = controls[:, pos:pos + R * W].reshape(B, R, W); pos += R * W
    betas_raw = controls[:, pos:pos + R]; pos += R
    gates_raw = controls[:, pos:pos + R * 3].reshape(B, R, 3)

    betas = (1.0 + jax.nn.softplus(betas_raw))[..., None]        # (B, R, 1)
    gates = jax.nn.softmax(gates_raw, axis=-1)                   # (B, R, 3)
    gate_pack = jnp.concatenate([betas, gates], axis=-1)         # (B, R, 4)

    read_weights, read_vector, new_links, new_precedence = _readhead_fused(
        memory, keys, gate_pack, write_weights,
        prev_read_weights.astype(jnp.float32), links, precedence)
    return read_vector, read_weights, new_links, new_precedence


class ReadHead:
    """Stateful JAX/Pallas mirror of the PyTorch ReadHead (default config)."""

    def __init__(self, n_reads, cell_width, masking=False, mask_min=0.0,
                 links=True, links_sharpening=False):
        # TODO(synk): masking / links_sharpening control branches are not
        # implemented in the Pallas path (only the default PyTorch config).
        assert links and not masking and not links_sharpening
        self.n_reads = n_reads
        self.cell_width = cell_width
        self.shapes = [[n_reads, cell_width], n_reads, [n_reads, 3]]
        self.input_size = n_reads * cell_width + n_reads + n_reads * 3
        self.read_weights = None
        self.read_vector = None
        self.links = None
        self.precedence = None

    def new_sequence(self):
        self.read_weights = None
        self.read_vector = None
        self.links = None
        self.precedence = None

    def get_last_weights(self, memory):
        if self.read_weights is None:
            B, N, _ = memory.shape
            return jnp.zeros((B, self.n_reads, N), jnp.float32)
        return self.read_weights

    def __call__(self, memory, controls, write_weights):
        B, N, _ = memory.shape
        if self.links is None:
            self.links = jnp.zeros((B, N, N), jnp.float32)
            self.precedence = jnp.zeros((B, 1, N), jnp.float32)
        prev_read = self.get_last_weights(memory)
        (self.read_vector, self.read_weights,
         self.links, self.precedence) = _readhead_step(
            memory, controls, write_weights, prev_read,
            self.links, self.precedence)
        return self.read_vector


# ---------------- pure-JAX reference (mirrors the torch forward) --------------
def _ref_readhead_step(memory, controls, write_w, prev_read, L, p):
    B, N, W = memory.shape
    R = prev_read.shape[1]
    hp = jax.lax.Precision.HIGHEST

    pos = 0
    keys = controls[:, pos:pos + R * W].reshape(B, R, W); pos += R * W
    betas = 1.0 + jax.nn.softplus(controls[:, pos:pos + R]); pos += R
    gates = jax.nn.softmax(controls[:, pos:pos + R * 3].reshape(B, R, 3), axis=-1)

    # temporal linkage
    wt_i = write_w[:, :, None]
    wt_j = write_w[:, None, :]
    pt_j = p[:, None, :]
    mask = (1.0 - jnp.eye(N, dtype=jnp.float32))[None]
    L = ((1.0 - wt_i - wt_j) * L + wt_i * pt_j) * mask
    p = (1.0 - write_w.sum(-1, keepdims=True)) * p + write_w
    fwd = jnp.einsum('bij,brj->bri', L, prev_read, precision=hp)
    bwd = jnp.einsum('bij,bri->brj', L, prev_read, precision=hp)

    # content addressing
    dots = jnp.einsum('brw,bnw->brn', keys, memory, precision=hp)
    key_norm = jnp.sqrt(jnp.sum(keys * keys, -1))
    mem_norm = jnp.sqrt(jnp.sum(memory * memory, -1))
    scores = dots / (key_norm[:, :, None] * mem_norm[:, None, :] + EPS)
    scores = scores * betas[:, :, None]
    content = jax.nn.softmax(scores, axis=-1)

    rw = gates[..., 0:1] * fwd + gates[..., 1:2] * bwd + gates[..., 2:3] * content
    rv = jnp.einsum('brn,bnw->brw', rw, memory, precision=hp)
    return rv, rw, L, p


if __name__ == "__main__":
    B, R, N, W = 4, 4, 128, 32           # batch, read heads, cells, cell width
    ctrl_size = R * W + R + R * 3        # ReadHead.input_size for default config

    key = jax.random.PRNGKey(0)
    k_mem, k_c0, k_c1, k_w0, k_w1 = jax.random.split(key, 5)
    memory = jax.random.normal(k_mem, (B, N, W), jnp.float32)
    controls0 = 0.5 * jax.random.normal(k_c0, (B, ctrl_size), jnp.float32)
    controls1 = 0.5 * jax.random.normal(k_c1, (B, ctrl_size), jnp.float32)
    write_w0 = jax.nn.softmax(jax.random.normal(k_w0, (B, N), jnp.float32), axis=-1)
    write_w1 = jax.nn.softmax(jax.random.normal(k_w1, (B, N), jnp.float32), axis=-1)

    # ---- Pallas ReadHead: two recurrent steps (state carried like nn.Module) ----
    head = ReadHead(n_reads=R, cell_width=W)
    head.new_sequence()
    rv0 = head(memory, controls0, write_w0)
    rv1 = head(memory, controls1, write_w1)
    jax.block_until_ready((rv0, rv1, head.read_weights, head.links, head.precedence))

    # ---- reference: same two steps ----
    L = jnp.zeros((B, N, N), jnp.float32)
    p = jnp.zeros((B, N), jnp.float32)
    prev_read = jnp.zeros((B, R, N), jnp.float32)
    r_rv0, r_rw0, L, p = _ref_readhead_step(memory, controls0, write_w0, prev_read, L, p)
    r_rv1, r_rw1, L, p = _ref_readhead_step(memory, controls1, write_w1, r_rw0, L, p)

    assert rv0.shape == (B, R, W) and rv1.shape == (B, R, W)
    assert jnp.allclose(rv0, r_rv0, atol=1e-4, rtol=1e-4)
    assert jnp.allclose(rv1, r_rv1, atol=1e-4, rtol=1e-4)
    assert jnp.allclose(head.read_weights, r_rw1, atol=1e-4, rtol=1e-4)
    assert jnp.allclose(head.links, L, atol=1e-4, rtol=1e-4)
    assert jnp.allclose(head.precedence[:, 0, :], p, atol=1e-4, rtol=1e-4)

    print("KERNEL_OK")
</pallas_src>

<mosaic_0001>
module attributes {stable_mosaic.version = 11 : i64} {
  func.func @_readhead_kernel(%arg0: i32, %arg1: memref<2x1x128xf32, #tpu.memory_space<vmem>>, %arg2: memref<2x128x1xf32, #tpu.memory_space<vmem>>, %arg3: memref<2x4x128xf32, #tpu.memory_space<vmem>>, %arg4: memref<2x128x128xf32, #tpu.memory_space<vmem>>, %arg5: memref<2x1x128xf32, #tpu.memory_space<vmem>>, %arg6: memref<2x128x32xf32, #tpu.memory_space<vmem>>, %arg7: memref<2x4x32xf32, #tpu.memory_space<vmem>>, %arg8: memref<2x4x4xf32, #tpu.memory_space<vmem>>, %arg9: memref<2x128x128xf32, #tpu.memory_space<vmem>>, %arg10: memref<2x1x128xf32, #tpu.memory_space<vmem>>, %arg11: memref<2x4x128xf32, #tpu.memory_space<vmem>>, %arg12: memref<2x1x128xf32, #tpu.memory_space<vmem>>) attributes {dimension_semantics = [#tpu.dimension_semantics<parallel>], iteration_bounds = array<i64: 2>, scalar_prefetch = 0 : i64, scratch_operands = 0 : i64, tpu.core_type = #tpu.core_type<tc>, window_params = [{transform_indices = @transform_0, window_bounds = array<i64: 2, 1, 128>}, {transform_indices = @transform_1, window_bounds = array<i64: 2, 128, 1>}, {transform_indices = @transform_2, window_bounds = array<i64: 2, 4, 128>}, {transform_indices = @transform_3, window_bounds = array<i64: 2, 128, 128>}, {transform_indices = @transform_4, window_bounds = array<i64: 2, 1, 128>}, {transform_indices = @transform_5, window_bounds = array<i64: 2, 128, 32>}, {transform_indices = @transform_6, window_bounds = array<i64: 2, 4, 32>}, {transform_indices = @transform_7, window_bounds = array<i64: 2, 4, 4>}, {transform_indices = @transform_8, window_bounds = array<i64: 2, 128, 128>}, {transform_indices = @transform_9, window_bounds = array<i64: 2, 1, 128>}, {transform_indices = @transform_10, window_bounds = array<i64: 2, 4, 128>}, {transform_indices = @transform_11, window_bounds = array<i64: 2, 1, 128>}]} {
    %c0 = arith.constant 0 : index
    %c0_0 = arith.constant 0 : index
    %c0_1 = arith.constant 0 : index
    %0 = vector.load %arg1[%c0, %c0_0, %c0_1] : memref<2x1x128xf32, #tpu.memory_space<vmem>>, vector<2x1x128xf32>
    %c0_2 = arith.constant 0 : index
    %c0_3 = arith.constant 0 : index
    %c0_4 = arith.constant 0 : index
    %1 = vector.load %arg2[%c0_2, %c0_3, %c0_4] : memref<2x128x1xf32, #tpu.memory_space<vmem>>, vector<2x128x1xf32>
    %c0_5 = arith.constant 0 : index
    %c0_6 = arith.constant 0 : index
    %c0_7 = arith.constant 0 : index
    %2 = vector.load %arg5[%c0_5, %c0_6, %c0_7] : memref<2x1x128xf32, #tpu.memory_space<vmem>>, vector<2x1x128xf32>
    %3 = tpu.iota {dimensions = array<i32: 0>} : vector<128x128xi32>
    %4 = tpu.iota {dimensions = array<i32: 1>} : vector<128x128xi32>
    %5 = arith.cmpi ne, %3, %4 : vector<128x128xi32>
    %6 = vector.shape_cast %5 : vector<128x128xi1> to vector<1x128x128xi1>
    %cst = arith.constant 1.000000e+00 : f32
    %7 = vector.broadcast %cst : f32 to vector<2x128x1xf32>
    %8 = arith.subf %7, %1 : vector<2x128x1xf32>
    %9 = vector.broadcast %8 : vector<2x128x1xf32> to vector<2x128x128xf32>
    %10 = vector.broadcast %0 : vector<2x1x128xf32> to vector<2x128x128xf32>
    %11 = arith.subf %9, %10 : vector<2x128x128xf32>
    %c0_8 = arith.constant 0 : index
    %c0_9 = arith.constant 0 : index
    %c0_10 = arith.constant 0 : index
    %12 = vector.load %arg4[%c0_8, %c0_9, %c0_10] : memref<2x128x128xf32, #tpu.memory_space<vmem>>, vector<2x128x128xf32>
    %13 = arith.mulf %11, %12 : vector<2x128x128xf32>
    %14 = vector.broadcast %1 : vector<2x128x1xf32> to vector<2x128x128xf32>
    %15 = vector.broadcast %2 : vector<2x1x128xf32> to vector<2x128x128xf32>
    %16 = arith.mulf %14, %15 : vector<2x128x128xf32>
    %17 = arith.addf %13, %16 : vector<2x128x128xf32>
    %cst_11 = arith.constant 0.000000e+00 : f32
    %18 = vector.shape_cast %6 : vector<1x128x128xi1> to vector<1x128x128xi1>
    %19 = vector.broadcast %18 : vector<1x128x128xi1> to vector<2x128x128xi1>
    %20 = vector.broadcast %cst_11 : f32 to vector<2x128x128xf32>
    %21 = arith.select %19, %17, %20 : vector<2x128x128xi1>, vector<2x128x128xf32>
    %c0_12 = arith.constant 0 : index
    %c0_13 = arith.constant 0 : index
    %c0_14 = arith.constant 0 : index
    %22 = vector.load %arg9[%c0_12, %c0_13, %c0_14] : memref<2x128x128xf32, #tpu.memory_space<vmem>>, vector<2x128x128xf32>
    tpu.vector_store %arg9[%c0_12, %c0_13, %c0_14], %21 {strides = array<i32>} : memref<2x128x128xf32, #tpu.memory_space<vmem>>, vector<2x128x128xf32>,
    %cst_15 = arith.constant dense<0.000000e+00> : vector<2x1xf32>
    %23 = vector.multi_reduction <add>, %0, %cst_15 [2] : vector<2x1x128xf32> to vector<2x1xf32>
    %24 = vector.shape_cast %23 : vector<2x1xf32> to vector<2x1x1xf32>
    %cst_16 = arith.constant 1.000000e+00 : f32
    %25 = vector.broadcast %cst_16 : f32 to vector<2x1x1xf32>
    %26 = arith.subf %25, %24 : vector<2x1x1xf32>
    %27 = vector.broadcast %26 : vector<2x1x1xf32> to vector<2x1x128xf32>
    %28 = arith.mulf %27, %2 : vector<2x1x128xf32>
    %29 = arith.addf %28, %0 : vector<2x1x128xf32>
    %c0_17 = arith.constant 0 : index
    %c0_18 = arith.constant 0 : index
    %c0_19 = arith.constant 0 : index
    %30 = vector.load %arg10[%c0_17, %c0_18, %c0_19] : memref<2x1x128xf32, #tpu.memory_space<vmem>>, vector<2x1x128xf32>
    tpu.vector_store %arg10[%c0_17, %c0_18, %c0_19], %29 {strides = array<i32>} : memref<2x1x128xf32, #tpu.memory_space<vmem>>, vector<2x1x128xf32>,
    %c0_20 = arith.constant 0 : index
    %c0_21 = arith.constant 0 : index
    %c0_22 = arith.constant 0 : index
    %31 = vector.load %arg3[%c0_20, %c0_21, %c0_22] : memref<2x4x128xf32, #tpu.memory_space<vmem>>, vector<2x4x128xf32>
    %c0_23 = arith.constant 0 : index
    %c0_24 = arith.constant 0 : index
    %c0_25 = arith.constant 0 : index
    %32 = vector.load %arg9[%c0_23, %c0_24, %c0_25] : memref<2x128x128xf32, #tpu.memory_space<vmem>>, vector<2x128x128xf32>
    "tpu.trace_start"() <{level = 10 : i32, message = "brj,bij->bri"}> : () -> ()
    %cst_26 = arith.constant dense<0.000000e+00> : vector<2x4x128xf32>
    %33 = tpu.matmul %31, %32, %cst_26 {dimension_numbers = #tpu.dot_dimension_numbers<[2], [2], [1], [1], [0, 0, 0, 1, 1, 1], [0], [0]>} : vector<2x4x128xf32>, vector<2x128x128xf32>, vector<2x4x128xf32> -> vector<2x4x128xf32>
    "tpu.trace_stop"() : () -> ()
    "tpu.trace_start"() <{level = 10 : i32, message = "bri,bij->brj"}> : () -> ()
    %cst_27 = arith.constant dense<0.000000e+00> : vector<2x4x128xf32>
    %34 = tpu.matmul %31, %32, %cst_27 {dimension_numbers = #tpu.dot_dimension_numbers<[2], [1], [1], [2], [0, 0, 0, 1, 1, 2], [0], [0]>} : vector<2x4x128xf32>, vector<2x128x128xf32>, vector<2x4x128xf32> -> vector<2x4x128xf32>
    "tpu.trace_stop"() : () -> ()
    %c0_28 = arith.constant 0 : index
    %c0_29 = arith.constant 0 : index
    %c0_30 = arith.constant 0 : index
    %35 = vector.load %arg6[%c0_28, %c0_29, %c0_30] : memref<2x128x32xf32, #tpu.memory_space<vmem>>, vector<2x128x32xf32>
    %c0_31 = arith.constant 0 : index
    %c0_32 = arith.constant 0 : index
    %c0_33 = arith.constant 0 : index
    %36 = vector.load %arg7[%c0_31, %c0_32, %c0_33] : memref<2x4x32xf32, #tpu.memory_space<vmem>>, vector<2x4x32xf32>
    "tpu.trace_start"() <{level = 10 : i32, message = "brw,bnw->brn"}> : () -> ()
    %cst_34 = arith.constant dense<0.000000e+00> : vector<2x4x128xf32>
    %37 = tpu.matmul %36, %35, %cst_34 {dimension_numbers = #tpu.dot_dimension_numbers<[2], [2], [1], [1], [0, 0, 0, 1, 1, 1], [0], [0]>} : vector<2x4x32xf32>, vector<2x128x32xf32>, vector<2x4x128xf32> -> vector<2x4x128xf32>
    "tpu.trace_stop"() : () -> ()
    %38 = arith.mulf %36, %36 : vector<2x4x32xf32>
    %cst_35 = arith.constant dense<0.000000e+00> : vector<2x4xf32>
    %39 = vector.multi_reduction <add>, %38, %cst_35 [2] : vector<2x4x32xf32> to vector<2x4xf32>
    %40 = vector.shape_cast %39 : vector<2x4xf32> to vector<2x4x1xf32>
    %41 = math.sqrt %40 : vector<2x4x1xf32>
    %42 = arith.mulf %35, %35 : vector<2x128x32xf32>
    %cst_36 = arith.constant dense<0.000000e+00> : vector<2x128xf32>
    %43 = vector.multi_reduction <add>, %42, %cst_36 [2] : vector<2x128x32xf32> to vector<2x128xf32>
    %44 = math.sqrt %43 : vector<2x128xf32>
    %c0_37 = arith.constant 0 : index
    %c0_38 = arith.constant 0 : index
    %c0_39 = arith.constant 0 : index
    %45 = vector.load %arg8[%c0_37, %c0_38, %c0_39] : memref<2x4x4xf32, #tpu.memory_space<vmem>>, vector<2x4x4xf32>
    %46 = vector.extract_strided_slice %45 {offsets = [0, 0, 0], sizes = [2, 4, 1], strides = [1, 1, 1]} : vector<2x4x4xf32> to vector<2x4x1xf32>
    %47 = vector.shape_cast %44 : vector<2x128xf32> to vector<2x1x128xf32>
    %48 = vector.broadcast %41 : vector<2x4x1xf32> to vector<2x4x128xf32>
    %49 = vector.broadcast %47 : vector<2x1x128xf32> to vector<2x4x128xf32>
    %50 = arith.mulf %48, %49 : vector<2x4x128xf32>
    %cst_40 = arith.constant 9.99999993E-9 : f32
    %51 = vector.broadcast %cst_40 : f32 to vector<2x4x128xf32>
    %52 = arith.addf %50, %51 : vector<2x4x128xf32>
    %53 = arith.divf %37, %52 : vector<2x4x128xf32>
    %54 = vector.broadcast %46 : vector<2x4x1xf32> to vector<2x4x128xf32>
    %55 = arith.mulf %53, %54 : vector<2x4x128xf32>
    %cst_41 = arith.constant dense<0xFF800000> : vector<2x4xf32>
    %56 = vector.multi_reduction <maximumf>, %55, %cst_41 [2] : vector<2x4x128xf32> to vector<2x4xf32>
    %57 = vector.shape_cast %56 : vector<2x4xf32> to vector<2x4x1xf32>
    %58 = vector.broadcast %57 : vector<2x4x1xf32> to vector<2x4x128xf32>
    %59 = arith.subf %55, %58 : vector<2x4x128xf32>
    %60 = math.exp %59 : vector<2x4x128xf32>
    %cst_42 = arith.constant dense<0.000000e+00> : vector<2x4xf32>
    %61 = vector.multi_reduction <add>, %60, %cst_42 [2] : vector<2x4x128xf32> to vector<2x4xf32>
    %62 = vector.shape_cast %61 : vector<2x4xf32> to vector<2x4x1xf32>
    %63 = vector.broadcast %62 : vector<2x4x1xf32> to vector<2x4x128xf32>
    %64 = arith.divf %60, %63 : vector<2x4x128xf32>
    %65 = vector.extract_strided_slice %45 {offsets = [0, 0, 1], sizes = [2, 4, 1], strides = [1, 1, 1]} : vector<2x4x4xf32> to vector<2x4x1xf32>
    %66 = vector.broadcast %65 : vector<2x4x1xf32> to vector<2x4x128xf32>
    %67 = arith.mulf %66, %33 : vector<2x4x128xf32>
    %68 = vector.extract_strided_slice %45 {offsets = [0, 0, 2], sizes = [2, 4, 1], strides = [1, 1, 1]} : vector<2x4x4xf32> to vector<2x4x1xf32>
    %69 = vector.broadcast %68 : vector<2x4x1xf32> to vector<2x4x128xf32>
    %70 = arith.mulf %69, %34 : vector<2x4x128xf32>
    %71 = arith.addf %67, %70 : vector<2x4x128xf32>
    %72 = vector.extract_strided_slice %45 {offsets = [0, 0, 3], sizes = [2, 4, 1], strides = [1, 1, 1]} : vector<2x4x4xf32> to vector<2x4x1xf32>
    %73 = vector.broadcast %72 : vector<2x4x1xf32> to vector<2x4x128xf32>
    %74 = arith.mulf %73, %64 : vector<2x4x128xf32>
    %75 = arith.addf %71, %74 : vector<2x4x128xf32>
    %c0_43 = arith.constant 0 : index
    %c0_44 = arith.constant 0 : index
    %c0_45 = arith.constant 0 : index
    %76 = vector.load %arg11[%c0_43, %c0_44, %c0_45] : memref<2x4x128xf32, #tpu.memory_space<vmem>>, vector<2x4x128xf32>
    tpu.vector_store %arg11[%c0_43, %c0_44, %c0_45], %75 {strides = array<i32>} : memref<2x4x128xf32, #tpu.memory_space<vmem>>, vector<2x4x128xf32>,
    "tpu.trace_start"() <{level = 10 : i32, message = "brn,bnw->brw"}> : () -> ()
    %cst_46 = arith.constant dense<0.000000e+00> : vector<2x4x32xf32>
    %77 = tpu.matmul %75, %35, %cst_46 {dimension_numbers = #tpu.dot_dimension_numbers<[2], [1], [1], [2], [0, 0, 0, 1, 1, 2], [0], [0]>} : vector<2x4x128xf32>, vector<2x128x32xf32>, vector<2x4x32xf32> -> vector<2x4x32xf32>
    "tpu.trace_stop"() : () -> ()
    %78 = vector.extract_strided_slice %77 {offsets = [0, 0, 0], sizes = [2, 1, 32], strides = [1, 1, 1]} : vector<2x4x32xf32> to vector<2x1x32xf32>
    %c0_47 = arith.constant 0 : index
    %c0_48 = arith.constant 0 : index
    %c0_49 = arith.constant 0 : index
    %79 = vector.load %arg12[%c0_47, %c0_48, %c0_49] : memref<2x1x128xf32, #tpu.memory_space<vmem>>, vector<2x1x32xf32>
    tpu.vector_store %arg12[%c0_47, %c0_48, %c0_49], %78 {strides = array<i32>} : memref<2x1x128xf32, #tpu.memory_space<vmem>>, vector<2x1x32xf32>,
    %80 = vector.extract_strided_slice %77 {offsets = [0, 1, 0], sizes = [2, 1, 32], strides = [1, 1, 1]} : vector<2x4x32xf32> to vector<2x1x32xf32>
    %c0_50 = arith.constant 0 : index
    %c0_51 = arith.constant 0 : index
    %c32 = arith.constant 32 : index
    %81 = vector.load %arg12[%c0_50, %c0_51, %c32] : memref<2x1x128xf32, #tpu.memory_space<vmem>>, vector<2x1x32xf32>
    tpu.vector_store %arg12[%c0_50, %c0_51, %c32], %80 {strides = array<i32>} : memref<2x1x128xf32, #tpu.memory_space<vmem>>, vector<2x1x32xf32>,
    %82 = vector.extract_strided_slice %77 {offsets = [0, 2, 0], sizes = [2, 1, 32], strides = [1, 1, 1]} : vector<2x4x32xf32> to vector<2x1x32xf32>
    %c0_52 = arith.constant 0 : index
    %c0_53 = arith.constant 0 : index
    %c64 = arith.constant 64 : index
    %83 = vector.load %arg12[%c0_52, %c0_53, %c64] : memref<2x1x128xf32, #tpu.memory_space<vmem>>, vector<2x1x32xf32>
    tpu.vector_store %arg12[%c0_52, %c0_53, %c64], %82 {strides = array<i32>} : memref<2x1x128xf32, #tpu.memory_space<vmem>>, vector<2x1x32xf32>,
    %84 = vector.extract_strided_slice %77 {offsets = [0, 3, 0], sizes = [2, 1, 32], strides = [1, 1, 1]} : vector<2x4x32xf32> to vector<2x1x32xf32>
    %c0_54 = arith.constant 0 : index
    %c0_55 = arith.constant 0 : index
    %c96 = arith.constant 96 : index
    %85 = vector.load %arg12[%c0_54, %c0_55, %c96] : memref<2x1x128xf32, #tpu.memory_space<vmem>>, vector<2x1x32xf32>
    tpu.vector_store %arg12[%c0_54, %c0_55, %c96], %84 {strides = array<i32>} : memref<2x1x128xf32, #tpu.memory_space<vmem>>, vector<2x1x32xf32>,
    return
  }
  func.func @transform_0(%arg0: i32) -> (i32, i32, i32) {
    %c0_i32 = arith.constant 0 : i32
    %c0_i32_0 = arith.constant 0 : i32
    %c0_i32_1 = arith.constant 0 : i32
    return %arg0, %c0_i32, %c0_i32_0 : i32, i32, i32
  }
  func.func @transform_1(%arg0: i32) -> (i32, i32, i32) {
    %c0_i32 = arith.constant 0 : i32
    %c0_i32_0 = arith.constant 0 : i32
    %c0_i32_1 = arith.constant 0 : i32
    return %arg0, %c0_i32, %c0_i32_0 : i32, i32, i32
  }
  func.func @transform_2(%arg0: i32) -> (i32, i32, i32) {
    %c0_i32 = arith.constant 0 : i32
    %c0_i32_0 = arith.constant 0 : i32
    %c0_i32_1 = arith.constant 0 : i32
    return %arg0, %c0_i32, %c0_i32_0 : i32, i32, i32
  }
  func.func @transform_3(%arg0: i32) -> (i32, i32, i32) {
    %c0_i32 = arith.constant 0 : i32
    %c0_i32_0 = arith.constant 0 : i32
    %c0_i32_1 = arith.constant 0 : i32
    return %arg0, %c0_i32, %c0_i32_0 : i32, i32, i32
  }
  func.func @transform_4(%arg0: i32) -> (i32, i32, i32) {
    %c0_i32 = arith.constant 0 : i32
    %c0_i32_0 = arith.constant 0 : i32
    %c0_i32_1 = arith.constant 0 : i32
    return %arg0, %c0_i32, %c0_i32_0 : i32, i32, i32
  }
  func.func @transform_5(%arg0: i32) -> (i32, i32, i32) {
    %c0_i32 = arith.constant 0 : i32
    %c0_i32_0 = arith.constant 0 : i32
    %c0_i32_1 = arith.constant 0 : i32
    return %arg0, %c0_i32, %c0_i32_0 : i32, i32, i32
  }
  func.func @transform_6(%arg0: i32) -> (i32, i32, i32) {
    %c0_i32 = arith.constant 0 : i32
    %c0_i32_0 = arith.constant 0 : i32
    %c0_i32_1 = arith.constant 0 : i32
    return %arg0, %c0_i32, %c0_i32_0 : i32, i32, i32
  }
  func.func @transform_7(%arg0: i32) -> (i32, i32, i32) {
    %c0_i32 = arith.constant 0 : i32
    %c0_i32_0 = arith.constant 0 : i32
    %c0_i32_1 = arith.constant 0 : i32
    return %arg0, %c0_i32, %c0_i32_0 : i32, i32, i32
  }
  func.func @transform_8(%arg0: i32) -> (i32, i32, i32) {
    %c0_i32 = arith.constant 0 : i32
    %c0_i32_0 = arith.constant 0 : i32
    %c0_i32_1 = arith.constant 0 : i32
    return %arg0, %c0_i32, %c0_i32_0 : i32, i32, i32
  }
  func.func @transform_9(%arg0: i32) -> (i32, i32, i32) {
    %c0_i32 = arith.constant 0 : i32
    %c0_i32_0 = arith.constant 0 : i32
    %c0_i32_1 = arith.constant 0 : i32
    return %arg0, %c0_i32, %c0_i32_0 : i32, i32, i32
  }
  func.func @transform_10(%arg0: i32) -> (i32, i32, i32) {
    %c0_i32 = arith.constant 0 : i32
    %c0_i32_0 = arith.constant 0 : i32
    %c0_i32_1 = arith.constant 0 : i32
    return %arg0, %c0_i32, %c0_i32_0 : i32, i32, i32
  }
  func.func @transform_11(%arg0: i32) -> (i32, i32, i32) {
    %c0_i32 = arith.constant 0 : i32
    %c0_i32_0 = arith.constant 0 : i32
    %c0_i32_1 = arith.constant 0 : i32
    return %arg0, %c0_i32, %c0_i32_0 : i32, i32, i32
  }
}

</mosaic_0001>

<bundles_post_ra>
// kernel: _readhead_step.1
= control target key start
LH: loop header
LB: loop body
LE: loop exit
PB: predicated region body
PF: predicated region fallthrough
CT: control target
= control target key end

     0   :  { %s4764_s0 = inlined_call_operand.vmem [shape: f32[4,1,128], index: 0, kind: input, shape index: {}]   ;;  %s4765_s1 = inlined_call_operand.vmem [shape: f32[4,128,1], index: 1, kind: input, shape index: {}]   ;;  %s4766_s2 = inlined_call_operand.vmem [shape: f32[4,4,128], index: 2, kind: input, shape index: {}]   ;;  %s4767_s3 = inlined_call_operand.vmem [shape: f32[4,128,128], index: 3, kind: input, shape index: {}, may-alias: {3,8}]   ;;  %s4768_s4 = inlined_call_operand.vmem [shape: f32[4,1,128], index: 4, kind: input, shape index: {}, may-alias: {4,9}]   ;;  %s4769_s5 = inlined_call_operand.vmem [shape: f32[4,128,32], index: 5, kind: input, shape index: {}]   ;;  %s4770_s6 = inlined_call_operand.vmem [shape: f32[4,4,32], index: 6, kind: input, shape index: {}]   ;;  %s4771_s7 = inlined_call_operand.vmem [shape: f32[4,4,4], index: 7, kind: input, shape index: {}]   ;;  %s4772_s8 = inlined_call_operand.vmem [shape: f32[4,128,128], index: 8, kind: output, shape index: {0}, may-alias: {3,8}]   ;;  %s4773_s9 = inlined_call_operand.vmem [shape: f32[4,1,128], index: 9, kind: output, shape index: {1}, may-alias: {4,9}]   ;;  %s4774_s10 = inlined_call_operand.hbm [shape: f32[4,4,128], index: 10, kind: output, shape index: {2}]   ;;  %s4775_s11 = inlined_call_operand.vmem [shape: f32[4,1,128], index: 11, kind: output, shape index: {3}]  }
   0x1   :  { %4777 = sst [smem:[#allocation5_spill]] %s4764_s0 }
   0x2   :  { %4778 = sst [smem:[#allocation6_spill]] %s4765_s1 }
   0x3   :  { %4779 = sst [smem:[#allocation7_spill]] %s4766_s2 }
   0x4   :  { %4780 = sst [smem:[#allocation8_spill]] %s4767_s3 }
   0x5   :  { %4781 = sst [smem:[#allocation9_spill]] %s4768_s4 }
   0x6   :  { %4782 = sst [smem:[#allocation10_spill]] %s4769_s5 }
   0x7   :  { %4783 = sst [smem:[#allocation11_spill]] %s4770_s6 }
   0x8   :  { %17 = vsyncpa [#allocation3], 0 }
   0x9   :  { %19 = vsyncpa [#allocation3 + $0x1], 0  ;;  %s3091_s17 = smov 0   ;;  %s3093_s18 = smov 0  }
   0xa   :  { %s3095_s19 = smov 0   ;;  %s3097_s20 = smov 0  }
   0xb LB: > { %s3112_s21 = sadd.s32 4294967295, %s3021_s20   ;;  %s2710_s22 = sadd.s32 4294967294, %s3021_s20   ;;  %s3021_s20 = sphi %s3097_s20, %s4797_s20   ;;  %s3017_s19 = sphi %s3095_s19, %s4796_s19   ;;  %s3013_s18 = sphi %s3093_s18, %s4795_s18   ;;  %s3009_s17 = sphi %s3091_s17, %s4794_s17  }
   0xc   : > { %s3116_s23 = sadd.s32 1, %s3021_s20   ;;  %s292_s24 = sadd.s32 1, %s3017_s19 }
   0xd   : > { %s289_s25 = ssub.s32 %s3021_s20, %s3116_s23  ;;  %p302_p0 = scmp.ne.s32.totalorder %s3017_s19, %s3013_s18 }
   0xe   : > { %p290_p1 = scmp.eq.s32.totalorder %s289_s25, 0  ;;  %p303_p2 = scmp.eq.s32.totalorder %s3112_s21, 1 }
   0xf   : > { %p308_p3 = scmp.ne.s32.totalorder %s3013_s18, %s3009_s17  ;;  %p309_p4 = scmp.eq.s32.totalorder %s2710_s22, 1 }
  0x10   : > { %s3127_s26 = scalar_select %p290_p1, %s3017_s19, %s292_s24  }
  0x11   : > { %p3129_p5 = por %p303_p2, %p302_p0  ;;  %p3133_p6 = por %p309_p4, %p308_p3 }
  0x12   : > { %p2713_p7 = scmp.ge.s32.totalorder %s3021_s20, 1  ;;  %p426_p8 = scmp.lt.s32.totalorder %s3021_s20, 3 }
  0x14   : > { %p427_p9 = pnand %p2713_p7, %p426_p8 }
  0x15   : > { %s2715_s29 = sshll.u32 (!%p427_p9), %s3112_s21, 1  ;;  %s4786_s1 = sld [smem:[#allocation6_spill]] (!%p427_p9) }
  0x16   : > { %430 = sbr.rel (%p427_p9) target bundleno = 1063 (0x427), region = 52  ;;  %p517_p10 = scmp.lt.s32.totalorder (!%p427_p9), %s2715_s29, 3 }
  0x17   : > { %s4787_s0 = sld [smem:[#allocation5_spill]] (!%p427_p9) }
  0x18   : > { %s4788_s4 = sld [smem:[#allocation9_spill]] (!%p427_p9) }
  0x19   : > { %s4789_s3 = sld [smem:[#allocation8_spill]] (!%p427_p9) }
  0x1a   : > { %s4790_s5 = sld [smem:[#allocation10_spill]] (!%p427_p9) }
  0x1b   : > { %v3023_v0 = vmov 0   ;;  %s4799_s29 = smov (!%p517_p10, %s2715_s29), 3  ;;  %vm1437_vm8 = vcmask 261120   ;;  %s4791_s6 = sld [smem:[#allocation11_spill]] }
  0x1c   : > { %2830 = vset.pattern.permute.xlu2 %v3023_v0  ;;  %2829 = vset.pattern.permute.xlu1 %v3023_v0  ;;  %s3143_s30 = sshll.u32 %s4799_s29, 7  ;;  %s4792_s2 = sld [smem:[#allocation7_spill]] }
  0x1d   : > { %2828 = vset.pattern.permute.xlu0 %v3023_v0  ;;  %s3149_s14 = scalar_lea.vmem %s4786_s1, %s3143_s30  ;;  %s3231_s22 = scalar_lea.vmem %s4787_s0, %s4799_s29 }
  0x1e   : > { %v3152_v1 = vld [vmem:[%s3149_s14 + $0x20] sm:$0xff]  ;;  %v3155_v2 = vld [vmem:[%s3149_s14 + $0x10] sm:$0xff]  ;;  %v3164_v7 = vld [vmem:[%s3149_s14 + $0x28] sm:$0xff]  ;;  %s3249_s12 = scalar_lea.vmem %s4788_s4, %s4799_s29  ;;  %s3280_s13 = scalar_lea.vmem %s4772_s8, %s3143_s30 }
  0x1f   : > { %v3158_v3 = vld [vmem:[%s3149_s14] sm:$0xff]  ;;  %v658_v4 = vsub.f32 1.0, %v3152_v1  ;;  %v656_v5 = vsub.f32 1.0, %v3155_v2  ;;  %v3167_v8 = vld [vmem:[%s3149_s14 + $0x18] sm:$0xff]  ;;  %v3170_v9 = vld [vmem:[%s3149_s14 + $0x8] sm:$0xff]  ;;  %v659_v10 = vsub.f32 1.0, %v3164_v7  ;;  %s3255_s16 = scalar_lea.vmem %s4789_s3, %s3143_s30 }
  0x20   : > { %v654_v6 = vsub.f32 1.0, %v3158_v3  ;;  %v657_v11 = vsub.f32 1.0, %v3167_v8  ;;  %v655_v12 = vsub.f32 1.0, %v3170_v9  ;;  %v3176_v13 = vld [vmem:[%s3149_s14 + $0x40] sm:$0xff]  ;;  %v3179_v14 = vld [vmem:[%s3149_s14 + $0x38] sm:$0xff]  ;;  %v3182_v15 = vld [vmem:[%s3149_s14 + $0x30] sm:$0xff]  ;;  %s3441_s24 = scalar_lea.vmem %s4790_s5, %s3143_s30 }
  0x21   : > { %708 = vperm.xlu2 %2830, %v658_v4   ;;  %698 = vperm.xlu1 %2829, %v656_v5   ;;  %v662_v16 = vsub.f32 1.0, %v3176_v13  ;;  %v661_v17 = vsub.f32 1.0, %v3179_v14  ;;  %v660_v18 = vsub.f32 1.0, %v3182_v15  ;;  %v596_v19 = vld [vmem:[%s3149_s14 + $0x58] sm:$0xff]  ;;  %v595_v20 = vld [vmem:[%s3149_s14 + $0x50] sm:$0xff]  ;;  %v594_v21 = vld [vmem:[%s3149_s14 + $0x48] sm:$0xff]  ;;  %v619_v5 = vlaneseq }
  0x22   : > { %688 = vperm.xlu0 %2828, %v654_v6   ;;  %v665_v22 = vsub.f32 1.0, %v596_v19  ;;  %v664_v23 = vsub.f32 1.0, %v595_v20  ;;  %v663_v24 = vsub.f32 1.0, %v594_v21  ;;  %v599_v25 = vld [vmem:[%s3149_s14 + $0x70] sm:$0xff]  ;;  %v598_v26 = vld [vmem:[%s3149_s14 + $0x68] sm:$0xff]  ;;  %v597_v27 = vld [vmem:[%s3149_s14 + $0x60] sm:$0xff] }
  0x23   : > { %v668_v28 = vsub.f32 1.0, %v599_v25  ;;  %v667_v29 = vsub.f32 1.0, %v598_v26  ;;  %v666_v30 = vsub.f32 1.0, %v597_v27  ;;  %v616_v31 = vld [vmem:[%s3149_s14 + $0xf8] sm:$0xff]  ;;  %v615_v35 = vld [vmem:[%s3149_s14 + $0xf0] sm:$0xff]  ;;  %v614_v37 = vld [vmem:[%s3149_s14 + $0xe8] sm:$0xff] }
  0x24   : > { %v600_v32 = vld [vmem:[%s3149_s14 + $0x78] sm:$0xff]  ;;  %v685_v33 = vsub.f32 1.0, %v616_v31  ;;  %v684_v36 = vsub.f32 1.0, %v615_v35  ;;  %v683_v38 = vsub.f32 1.0, %v614_v37  ;;  %v613_v39 = vld [vmem:[%s3149_s14 + $0xe0] sm:$0xff]  ;;  %v611_v43 = vld [vmem:[%s3149_s14 + $0xd0] sm:$0xff] }
  0x25   : > { %v669_v34 = vsub.f32 1.0, %v600_v32  ;;  %v682_v40 = vsub.f32 1.0, %v613_v39  ;;  %v612_v41 = vld [vmem:[%s3149_s14 + $0xd8] sm:$0xff]  ;;  %v680_v44 = vsub.f32 1.0, %v611_v43  ;;  %v610_v45 = vld [vmem:[%s3149_s14 + $0xc8] sm:$0xff]  ;;  %v609_v48 = vld [vmem:[%s3149_s14 + $0xc0] sm:$0xff] }
  0x26   : > { %v681_v42 = vsub.f32 1.0, %v612_v41  ;;  %v679_v46 = vsub.f32 1.0, %v610_v45  ;;  %v678_v49 = vsub.f32 1.0, %v609_v48  ;;  %v608_v51 = vld [vmem:[%s3149_s14 + $0xb8] sm:$0xff]  ;;  %v607_v54 = vld [vmem:[%s3149_s14 + $0xb0] sm:$0xff]  ;;  %v606_v58 = vld [vmem:[%s3149_s14 + $0xa8] sm:$0xff] }
  0x27   : > { %v677_v52 = vsub.f32 1.0, %v608_v51  ;;  %v676_v55 = vsub.f32 1.0, %v607_v54  ;;  %v675_v60 = vsub.f32 1.0, %v606_v58  ;;  %v605_v63 = vld [vmem:[%s3149_s14 + $0xa0] sm:$0xff]  ;;  %s3904_s30 = sshll.u32 %s4799_s29, 2  ;;  %s3029_s1 = smov 96  }
  0x28   : > { %v674_v4 = vsub.f32 1.0, %v605_v63  ;;  %s4023_s15 = scalar_lea.vmem %s4792_s2, %s3904_s30  ;;  %s4793_s3 = sand.u32 1, %s3013_s18  }
  0x29   : > { %713 = vperm.xlu2 %2830, %v659_v10   ;;  %703 = vperm.xlu1 %2829, %v657_v11   ;;  %v604_v10 = vld [vmem:[%s3149_s14 + $0x98] sm:$0xff]  ;;  %s2473_s4 = scalar_lea.sflag [#allocation3], %s4793_s3 }
  0x2a   : > { %693 = vperm.xlu0 %2828, %v655_v12   ;;  %v3240_v12 = vshrl.u32 %v619_v5, 7 }
  0x31   : > { %728 = vperm.xlu2 %2830, %v662_v16   ;;  %723 = vperm.xlu1 %2829, %v661_v17   ;;  %v3261_v16 = vadd.s32 112, %v3240_v12  ;;  %v3263_v17 = vand.u32 127, %v619_v5 }
  0x32   : > { %718 = vperm.xlu0 %2828, %v660_v18   ;;  %v3266_v18 = vld [vmem:[%s3249_s12] ss:$0 sm:$0xff] }
  0x33   : > { %vm652_vm0 = vcmp.ne.s32.totalorder %v3261_v16, %v3263_v17 }
  0x39   : > { %743 = vperm.xlu2 %2830, %v665_v22   ;;  %738 = vperm.xlu1 %2829, %v664_v23  }
  0x3a   : > { %733 = vperm.xlu0 %2828, %v663_v24  }
  0x41   : > { %758 = vperm.xlu2 %2830, %v668_v28   ;;  %753 = vperm.xlu1 %2829, %v667_v29  }
  0x42   : > { %748 = vperm.xlu0 %2828, %v666_v30  }
  0x49   : > { %1025 = vperm.xlu2 %2830, %v600_v32   ;;  %843 = vperm.xlu1 %2829, %v685_v33   ;;  %v3293_v32 = vadd.s32 104, %v3240_v12 }
  0x4a   : > { %763 = vperm.xlu0 %2828, %v669_v34  }
  0x4b   : > { %vm651_vm1 = vcmp.ne.s32.totalorder %v3293_v32, %v3263_v17 }
  0x51   : > { %1020 = vperm.xlu2 %2830, %v599_v25   ;;  %1105 = vperm.xlu1 %2829, %v616_v31   ;;  %v602_v31 = vld [vmem:[%s3149_s14 + $0x88] sm:$0xff] }
  0x52   : > { %838 = vperm.xlu0 %2828, %v684_v36   ;;  %v671_v36 = vsub.f32 1.0, %v602_v31 }
  0x59   : > { %1015 = vperm.xlu2 %2830, %v598_v26   ;;  %1100 = vperm.xlu1 %2829, %v615_v35   ;;  %v3283_v26 = vld [vmem:[%s3255_s16 + $0xf0] sm:$0xff] }
  0x5a   : > { %833 = vperm.xlu0 %2828, %v683_v38  }
  0x61   : > { %1010 = vperm.xlu2 %2830, %v597_v27   ;;  %1095 = vperm.xlu1 %2829, %v614_v37  }
  0x62   : > { %828 = vperm.xlu0 %2828, %v682_v40  }
  0x69   : > { %1005 = vperm.xlu2 %2830, %v596_v19   ;;  %1090 = vperm.xlu1 %2829, %v613_v39  }
  0x6a   : > { %823 = vperm.xlu0 %2828, %v681_v42  }
  0x71   : > { %1000 = vperm.xlu2 %2830, %v595_v20   ;;  %1085 = vperm.xlu1 %2829, %v612_v41   ;;  %v3306_v41 = vadd.s32 96, %v3240_v12 }
  0x72   : > { %818 = vperm.xlu0 %2828, %v680_v44  }
  0x73   : > { %vm650_vm2 = vcmp.ne.s32.totalorder %v3306_v41, %v3263_v17 }
  0x79   : > { %995 = vperm.xlu2 %2830, %v594_v21   ;;  %1080 = vperm.xlu1 %2829, %v611_v43   ;;  %v603_v21 = vld [vmem:[%s3149_s14 + $0x90] sm:$0xff] }
  0x7a   : > { %813 = vperm.xlu0 %2828, %v679_v46   ;;  %v672_v25 = vsub.f32 1.0, %v603_v21 }
  0x7b   : > { %v3201_v47 = vpop.permute.xlu2 %708 }
  0x81   : > { %990 = vperm.xlu2 %2830, %v3176_v13   ;;  %1075 = vperm.xlu1 %2829, %v610_v45   ;;  %v673_v13 = vsub.f32 1.0, %v604_v10  ;;  %v601_v45 = vld [vmem:[%s3149_s14 + $0x80] sm:$0xff]  ;;  %s557_s14 = scalar_lea.vmem %s4791_s6, %s3904_s30  ;;  %s2979_s6 = scalar_lea.hbm %s4774_s10, 16 }
  0x82   : > { %808 = vperm.xlu0 %2828, %v678_v49   ;;  %v3315_v49 = vld [vmem:[%s3231_s22 + $0x1] ss:$0 sm:$0xff] }
  0x83   : > { %v3205_v50 = vpop.permute.xlu2 %713 }
  0x89   : > { %985 = vperm.xlu2 %2830, %v3179_v14   ;;  %1070 = vperm.xlu1 %2829, %v609_v48  }
  0x8a   : > { %803 = vperm.xlu0 %2828, %v677_v52   ;;  %v635_v52 = vadd.s32 120, %v3240_v12 }
  0x8b   : > { %v3209_v53 = vpop.permute.xlu2 %728 }
  0x8c   : > { %vm653_vm3 = vcmp.ne.s32.totalorder %v635_v52, %v3263_v17 }
  0x91   : > { %980 = vperm.xlu2 %2830, %v3182_v15   ;;  %1065 = vperm.xlu1 %2829, %v608_v51   ;;  %v898_v15 = vld [vmem:[%s3255_s16 + $0x70] sm:$0xff] }
  0x92   : > { %798 = vperm.xlu0 %2828, %v676_v55  }
  0x93   : > { %v3213_v56 = vpop.permute.xlu2 %743  ;;  %v3215_v57 = vpop.permute.xlu1 %698 }
  0x94   : > { %v3218_v59 = vpop.permute.xlu0 %688 }
  0x99   : > { %975 = vperm.xlu2 %2830, %v3164_v7   ;;  %1060 = vperm.xlu1 %2829, %v607_v54  }
  0x9a   : > { %793 = vperm.xlu0 %2828, %v675_v60  }
  0x9b   : > { %v759_v61 = vpop.permute.xlu2 %758  ;;  %v3221_v62 = vpop.permute.xlu1 %703 }
  0x9c   : > { %v3224_v0 = vpop.permute.xlu0 %693 }
  0xa1   : > { %970 = vperm.xlu2 %2830, %v3152_v1   ;;  %1055 = vperm.xlu1 %2829, %v606_v58   ;;  %v3243_v1 = vld [vmem:[%s3231_s22] ss:$0 sm:$0xff]  ;;  %v670_v58 = vsub.f32 1.0, %v601_v45 }
  0xa2   : > { %788 = vperm.xlu0 %2828, %v674_v4   ;;  %v866_v14 = vsub.f32 %v759_v61, %v3243_v1  ;;  %v863_v4 = vsub.f32 %v3213_v56, %v3243_v1  ;;  %v3341_v56 = vadd.s32 88, %v3240_v12 }
  0xa3   : > { %v3233_v6 = vpop.permute.xlu2 %1025  ;;  %v3235_v7 = vpop.permute.xlu1 %723 }
  0xa4   : > { %v3238_v11 = vpop.permute.xlu0 %718  ;;  %v930_v22 = vmul.f32 %v898_v15, %v866_v14  ;;  %v1129_v61 = vmul.f32 %v3266_v18, %v3233_v6  ;;  %vm649_vm4 = vcmp.ne.s32.totalorder %v3341_v56, %v3263_v17 }
  0xa9   : > { %965 = vperm.xlu2 %2830, %v3167_v8   ;;  %1050 = vperm.xlu1 %2829, %v605_v63  }
  0xaa   : > { %783 = vperm.xlu0 %2828, %v673_v13   ;;  %v3335_v13 = vld [vmem:[%s3249_s12 + $0x1] ss:$0 sm:$0xff] }
  0xab   : > { %v1021_v19 = vpop.permute.xlu2 %1020  ;;  %v3268_v20 = vpop.permute.xlu1 %738 }
  0xac   : > { %v1128_v23 = vmul.f32 %v3266_v18, %v1021_v19  ;;  %v3272_v8 = vpop.permute.xlu0 %733 }
  0xae   : > { %v1160_v24 = vadd.f32 %v1128_v23, %v930_v22 }
  0xb0   : > { %v1224_v27 = vsel %vm652_vm0, %v1160_v24, 0.0 }
  0xb1   : > { %960 = vperm.xlu2 %2830, %v3155_v2   ;;  %1045 = vperm.xlu1 %2829, %v604_v10   ;;  %1256 = vst [vmem:[%s3280_s13 + $0x70] sm:$0xff] %v1224_v27 }
  0xb2   : > { %778 = vperm.xlu0 %2828, %v672_v25  }
  0xb3   : > { %v1016_v28 = vpop.permute.xlu2 %1015  ;;  %v754_v30 = vpop.permute.xlu1 %753 }
  0xb4   : > { %v865_v33 = vsub.f32 %v754_v30, %v3243_v1  ;;  %v749_v34 = vpop.permute.xlu0 %748  ;;  %v1127_v35 = vmul.f32 %v3266_v18, %v1016_v28 }
  0xb5   : > { %v864_v38 = vsub.f32 %v749_v34, %v3243_v1 }
  0xb8   : > { %v897_v29 = vld [vmem:[%s3255_s16 + $0x68] sm:$0xff]  ;;  %v896_v40 = vld [vmem:[%s3255_s16 + $0x60] sm:$0xff] }
  0xb9   : > { %v929_v2 = vmul.f32 %v897_v29, %v865_v33  ;;  %v3301_v39 = vld [vmem:[%s3255_s16 + $0xe8] sm:$0xff]  ;;  %1040 = vperm.xlu1 %2829, %v603_v21   ;;  %955 = vperm.xlu2 %2830, %v3170_v9   ;;  %v928_v46 = vmul.f32 %v896_v40, %v864_v38 }
  0xba   : > { %773 = vperm.xlu0 %2828, %v671_v36   ;;  %v3365_v36 = vadd.s32 80, %v3240_v12 }
  0xbb   : > { %v1159_v37 = vadd.f32 %v1127_v35, %v929_v2  ;;  %v1011_v43 = vpop.permute.xlu2 %1010  ;;  %v844_v44 = vpop.permute.xlu1 %843 }
  0xbc   : > { %v1126_v48 = vmul.f32 %v3266_v18, %v1011_v43  ;;  %v764_v51 = vpop.permute.xlu0 %763  ;;  %v883_v10 = vsub.f32 %v844_v44, %v3315_v49  ;;  %vm648_vm5 = vcmp.ne.s32.totalorder %v3365_v36, %v3263_v17 }
  0xbd   : > { %v1223_v42 = vsel %vm651_vm1, %v1159_v37, 0.0  ;;  %v867_v54 = vsub.f32 %v764_v51, %v3243_v1 }
  0xbe   : > { %1255 = vst [vmem:[%s3280_s13 + $0x68] sm:$0xff] %v1223_v42  ;;  %v1158_v55 = vadd.f32 %v1126_v48, %v928_v46 }
  0xc0   : > { %v1222_v5 = vsel %vm650_vm2, %v1158_v55, 0.0 }
  0xc1   : > { %1035 = vperm.xlu1 %2829, %v602_v31   ;;  %950 = vperm.xlu2 %2830, %v3158_v3   ;;  %v862_v31 = vsub.f32 %v3268_v20, %v3243_v1 }
  0xc2   : > { %768 = vperm.xlu0 %2828, %v670_v58   ;;  %v3393_v58 = vadd.s32 72, %v3240_v12 }
  0xc3   : > { %v1006_v6 = vpop.permute.xlu2 %1005  ;;  %v1106_v21 = vpop.permute.xlu1 %1105 }
  0xc4   : > { %v1125_v25 = vmul.f32 %v3266_v18, %v1006_v6  ;;  %v1145_v27 = vmul.f32 %v3335_v13, %v1106_v21  ;;  %v839_v3 = vpop.permute.xlu0 %838  ;;  %vm647_vm6 = vcmp.ne.s32.totalorder %v3393_v58, %v3263_v17  ;;  %v860_v6 = vsub.f32 %v3209_v53, %v3243_v1 }
  0xc5   : > { %v899_v9 = vld [vmem:[%s3255_s16 + $0x78] sm:$0xff]  ;;  %v3323_v60 = vld [vmem:[%s3255_s16 + $0xe0] sm:$0xff]  ;;  %v882_v35 = vsub.f32 %v839_v3, %v3315_v49 }
  0xc6   : > { %v931_v63 = vmul.f32 %v899_v9, %v867_v54  ;;  %v895_v14 = vld [vmem:[%s3255_s16 + $0x58] sm:$0xff]  ;;  %v861_v9 = vsub.f32 %v3272_v8, %v3243_v1 }
  0xc7   : > { %v915_v15 = vld [vmem:[%s3255_s16 + $0xf8] sm:$0xff]  ;;  %v927_v23 = vmul.f32 %v895_v14, %v863_v4  ;;  %v946_v40 = vmul.f32 %v3283_v26, %v882_v35 }
  0xc8   : > { %v1161_v19 = vadd.f32 %v1129_v61, %v931_v63  ;;  %1254 = vst [vmem:[%s3280_s13 + $0x60] sm:$0xff] %v1222_v5  ;;  %v947_v24 = vmul.f32 %v915_v15, %v883_v10 }
  0xc9   : > { %v1157_v28 = vadd.f32 %v1125_v25, %v927_v23  ;;  %v1305_v23 = vld [vmem:[%s3280_s13 + $0x70] sm:$0xff]  ;;  %v3423_v25 = vadd.s32 64, %v3240_v12 }
  0xca   : > { %v1225_v22 = vsel %vm653_vm3, %v1161_v19, 0.0  ;;  %v1177_v29 = vadd.f32 %v1145_v27, %v947_v24  ;;  %1030 = vperm.xlu0 %2828, %v601_v45  }
  0xcb   : > { %1257 = vst [vmem:[%s3280_s13 + $0x78] sm:$0xff] %v1225_v22  ;;  %v1221_v33 = vsel %vm649_vm4, %v1157_v28, 0.0  ;;  %v1001_v20 = vpop.permute.xlu2 %1000  ;;  %v1101_v37 = vpop.permute.xlu1 %1100  ;;  %vm646_vm7 = vcmp.ne.s32.totalorder %v3423_v25, %v3263_v17 }
  0xcc   : > { %v1241_v34 = vsel %vm653_vm3, %v1177_v29, 0.0  ;;  %2927 = vmatpush.xpose.msk.msra.mxu1 %vm653_vm3, %v1177_v29  ;;  %2928 = vmatpush.msk.msra.mxu3 %vm653_vm3, %v1177_v29  ;;  %v1124_v42 = vmul.f32 %v3266_v18, %v1001_v20  ;;  %v1144_v43 = vmul.f32 %v3335_v13, %v1101_v37  ;;  %v834_v44 = vpop.permute.xlu0 %833  ;;  %vm2162_vm3 = vcmask 130112  }
  0xcd   : > { %v881_v52 = vsub.f32 %v834_v44, %v3315_v49 }
  0xce   : > { %v1176_v45 = vadd.f32 %v1144_v43, %v946_v40  ;;  %v1304_v40 = vld [vmem:[%s3280_s13 + $0x68] sm:$0xff]  ;;  %v3465_v43 = vld [vmem:[%s3441_s24] sm:$0xff] }
  0xcf   : > { %v945_v4 = vmul.f32 %v3301_v39, %v881_v52 }
  0xd0   : > { %v1240_v51 = vsel %vm652_vm0, %v1176_v45, 0.0  ;;  %2929 = vmatpush.xpose.msk.msra.mxu1 %vm652_vm0, %v1176_v45  ;;  %2930 = vmatpush.msk.msra.mxu3 %vm652_vm0, %v1176_v45  ;;  %vm638_vm0 = vcmp.ne.s32.totalorder %v3240_v12, %v3263_v17 }
  0xd2   : > { %v3352_v30 = vld [vmem:[%s3255_s16 + $0xd8] sm:$0xff]  ;;  %v894_v2 = vld [vmem:[%s3255_s16 + $0x50] sm:$0xff] }
  0xd3   : > { %1273 = vst [vmem:[%s3280_s13 + $0xf8] sm:$0xff] %v1241_v34  ;;  %v926_v38 = vmul.f32 %v894_v2, %v862_v31  ;;  %v1306_v54 = vld [vmem:[%s3280_s13 + $0x78] sm:$0xff]  ;;  %v996_v8 = vpop.permute.xlu2 %995  ;;  %v1096_v61 = vpop.permute.xlu1 %1095 }
  0xd4   : > { %1253 = vst [vmem:[%s3280_s13 + $0x58] sm:$0xff] %v1221_v33  ;;  %1323 = vmatpush.xpose.msra.mxu0 %v1306_v54  ;;  %1363 = vmatpush.msra.mxu2 %v1306_v54  ;;  %v1123_v5 = vmul.f32 %v3266_v18, %v996_v8  ;;  %v1143_v10 = vmul.f32 %v3335_v13, %v1096_v61  ;;  %v829_v14 = vpop.permute.xlu0 %828 }
  0xd5   : > { %v1156_v46 = vadd.f32 %v1124_v42, %v926_v38  ;;  %v880_v22 = vsub.f32 %v829_v14, %v3315_v49  ;;  %v3458_v42 = vld [vmem:[%s3441_s24 + $0x8] sm:$0xff]  ;;  %v1613_v54 = vmul.f32 %v3465_v43, %v3465_v43  ;;  %v858_v61 = vsub.f32 %v3238_v11, %v3243_v1 }
  0xd6   : > { %v1175_v15 = vadd.f32 %v1143_v10, %v945_v4  ;;  %1364 = vmatpush.msra.mxu2 %v1305_v23 }
  0xd7   : > { %v1220_v26 = vsel %vm648_vm5, %v1156_v46, 0.0  ;;  %v944_v28 = vmul.f32 %v3323_v60, %v880_v22  ;;  %v859_v60 = vsub.f32 %v3235_v7, %v3243_v1  ;;  %v3462_v7 = vadd.s32 56, %v3240_v12 }
  0xd8   : > { %v1239_v21 = vsel %vm651_vm1, %v1175_v15, 0.0  ;;  %1324 = vmatpush.xpose.msra.mxu0 %v1305_v23  ;;  %2931 = vmatpush.xpose.msk.msra.mxu1 %vm651_vm1, %v1175_v15  ;;  %v1645_v11 = vsel %vm1437_vm8, %v1613_v54, 0.0 }
  0xd9   : > { %2932 = vmatpush.msk.msra.mxu3 %vm651_vm1, %v1175_v15  ;;  %1365 = vmatpush.msra.mxu2 %v1304_v40  ;;  %vm645_vm9 = vcmp.ne.s32.totalorder %v3462_v7, %v3263_v17  ;;  %v3500_v15 = vld [vmem:[%s3441_s24 + $0x80] sm:$0xff]  ;;  %vm1582_vm1 = vcmask 257024  }
  0xdb   : > { %v3378_v48 = vld [vmem:[%s3255_s16 + $0xd0] sm:$0xff]  ;;  %v893_v55 = vld [vmem:[%s3255_s16 + $0x48] sm:$0xff]  ;;  %v991_v53 = vpop.permute.xlu2 %990  ;;  %v1091_v27 = vpop.permute.xlu1 %1090 }
  0xdc   : > { %1272 = vst [vmem:[%s3280_s13 + $0xf0] sm:$0xff] %v1240_v51  ;;  %v925_v63 = vmul.f32 %v893_v55, %v861_v9  ;;  %v1122_v29 = vmul.f32 %v3266_v18, %v991_v53  ;;  %v1142_v31 = vmul.f32 %v3335_v13, %v1091_v27  ;;  %v824_v33 = vpop.permute.xlu0 %823  ;;  %1325 = vmatpush.xpose.msra.mxu0 %v1304_v40  ;;  %v1302_v40 = vld [vmem:[%s3280_s13 + $0x58] sm:$0xff] }
  0xdd   : > { %1252 = vst [vmem:[%s3280_s13 + $0x50] sm:$0xff] %v1220_v26  ;;  %v879_v38 = vsub.f32 %v824_v33, %v3315_v49  ;;  %v1614_v9 = vmul.f32 %v3458_v42, %v3458_v42  ;;  %v1629_v53 = vmul.f32 %v3500_v15, %v3500_v15 }
  0xde   : > { %v1155_v16 = vadd.f32 %v1123_v5, %v925_v63  ;;  %v1174_v34 = vadd.f32 %v1142_v31, %v944_v28 }
  0xdf   : > { %v943_v26 = vmul.f32 %v3352_v30, %v879_v38  ;;  %v1648_v30 = vsel %vm1437_vm8, %v1614_v9, 0.0  ;;  %v3555_v9 = vld [vmem:[%s3441_s24 + $0x20] sm:$0xff] }
  0xe0   : > { %v1219_v39 = vsel %vm647_vm6, %v1155_v16, 0.0  ;;  %v1238_v37 = vsel %vm650_vm2, %v1174_v34, 0.0  ;;  %2933 = vmatpush.xpose.msk.msra.mxu1 %vm650_vm2, %v1174_v34  ;;  %2934 = vmatpush.msk.msra.mxu3 %vm650_vm2, %v1174_v34  ;;  %v1303_v16 = vld [vmem:[%s3280_s13 + $0x60] sm:$0xff]  ;;  %v1693_v34 = vsel %vm1437_vm8, %v1629_v53, 0.0 }
  0xe1   : > { %1326 = vmatpush.xpose.msra.mxu0 %v1303_v16  ;;  %1366 = vmatpush.msra.mxu2 %v1303_v16 }
  0xe3   : > { %v986_v46 = vpop.permute.xlu2 %985  ;;  %v1086_v45 = vpop.permute.xlu1 %1085  ;;  %1367 = vmatpush.msra.mxu2 %v1302_v40 }
  0xe4   : > { %v3408_v19 = vld [vmem:[%s3255_s16 + $0xc8] sm:$0xff]  ;;  %v892_v24 = vld [vmem:[%s3255_s16 + $0x40] sm:$0xff]  ;;  %v1121_v51 = vmul.f32 %v3266_v18, %v986_v46  ;;  %v1141_v52 = vmul.f32 %v3335_v13, %v1086_v45  ;;  %v819_v41 = vpop.permute.xlu0 %818  ;;  %v3551_v46 = vadd.s32 40, %v3240_v12  ;;  %v1301_v53 = vld [vmem:[%s3280_s13 + $0x50] sm:$0xff] }
  0xe5   : > { %1271 = vst [vmem:[%s3280_s13 + $0xe8] sm:$0xff] %v1239_v21  ;;  %v924_v3 = vmul.f32 %v892_v24, %v860_v6  ;;  %v878_v14 = vsub.f32 %v819_v41, %v3315_v49  ;;  %v3504_v6 = vadd.s32 48, %v3240_v12  ;;  %v3513_v21 = vld [vmem:[%s3441_s24 + $0x10] sm:$0xff]  ;;  %1327 = vmatpush.xpose.msra.mxu0 %v1302_v40  ;;  %1368 = vmatpush.msra.mxu2 %v1301_v53 }
  0xe6   : > { %1251 = vst [vmem:[%s3280_s13 + $0x48] sm:$0xff] %v1219_v39  ;;  %v1173_v8 = vadd.f32 %v1141_v52, %v943_v26  ;;  %v3507_v39 = vld [vmem:[%s3441_s24 + $0x88] sm:$0xff]  ;;  %v1615_v56 = vmul.f32 %v3513_v21, %v3513_v21  ;;  %v3561_v26 = vld [vmem:[%s3441_s24 + $0x90] sm:$0xff]  ;;  %vm643_vm11 = vcmp.ne.s32.totalorder %v3551_v46, %v3263_v17 }
  0xe7   : > { %v1154_v32 = vadd.f32 %v1122_v29, %v924_v3  ;;  %v942_v27 = vmul.f32 %v3378_v48, %v878_v14  ;;  %v1630_v31 = vmul.f32 %v3507_v39, %v3507_v39  ;;  %vm644_vm10 = vcmp.ne.s32.totalorder %v3504_v6, %v3263_v17 }
  0xe8   : > { %v1237_v10 = vsel %vm649_vm4, %v1173_v8, 0.0  ;;  %2935 = vmatpush.xpose.msk.msra.mxu1 %vm649_vm4, %v1173_v8  ;;  %2936 = vmatpush.msk.msra.mxu3 %vm649_vm4, %v1173_v8  ;;  %v857_v48 = vsub.f32 %v3205_v50, %v3243_v1  ;;  %v1651_v45 = vsel %vm1437_vm8, %v1615_v56, 0.0  ;;  %v1631_v36 = vmul.f32 %v3561_v26, %v3561_v26 }
  0xe9   : > { %v1218_v20 = vsel %vm646_vm7, %v1154_v32, 0.0  ;;  %v1696_v50 = vsel %vm1437_vm8, %v1630_v31, 0.0  ;;  %1328 = vmatpush.xpose.msra.mxu0 %v1301_v53  ;;  %v3609_v31 = vld [vmem:[%s3441_s24 + $0x28] sm:$0xff] }
  0xea   : > { %1649 = vadd.xlane.f32.xlu2 %v1648_v30  ;;  %v1618_v58 = vmul.f32 %v3609_v31, %v3609_v31 }
  0xeb   : > { %v981_v23 = vpop.permute.xlu2 %980  ;;  %1646 = vadd.xlane.f32.xlu1 %v1645_v11  ;;  %v1081_v24 = vpop.permute.xlu1 %1080 }
  0xec   : > { %v1120_v3 = vmul.f32 %v3266_v18, %v981_v23  ;;  %v1140_v28 = vmul.f32 %v3335_v13, %v1081_v24  ;;  %v814_v29 = vpop.permute.xlu0 %813 }
  0xed   : > { %v3446_v35 = vld [vmem:[%s3255_s16 + $0xc0] sm:$0xff]  ;;  %v891_v2 = vld [vmem:[%s3255_s16 + $0x38] sm:$0xff]  ;;  %v877_v38 = vsub.f32 %v814_v29, %v3315_v49 }
  0xee   : > { %1270 = vst [vmem:[%s3280_s13 + $0xe0] sm:$0xff] %v1238_v37  ;;  %v923_v44 = vmul.f32 %v891_v2, %v859_v60  ;;  %v1172_v32 = vadd.f32 %v1140_v28, %v942_v27  ;;  %v3595_v27 = vld [vmem:[%s3441_s24 + $0x98] sm:$0xff]  ;;  %v1699_v28 = vsel %vm1437_vm8, %v1631_v36, 0.0  ;;  %v3603_v29 = vld [vmem:[%s3441_s24 + $0xa0] sm:$0xff] }
  0xef   : > { %1250 = vst [vmem:[%s3280_s13 + $0x40] sm:$0xff] %v1218_v20  ;;  %v3651_v36 = vld [vmem:[%s3441_s24 + $0x38] sm:$0xff] }
  0xf0   : > { %v1153_v55 = vadd.f32 %v1121_v51, %v923_v44  ;;  %v1236_v37 = vsel %vm648_vm5, %v1172_v32, 0.0  ;;  %v3547_v44 = vld [vmem:[%s3441_s24 + $0x18] sm:$0xff]  ;;  %2937 = vmatpush.xpose.msk.msra.mxu1 %vm648_vm5, %v1172_v32  ;;  %2938 = vmatpush.msk.msra.mxu3 %vm648_vm5, %v1172_v32 }
  0xf1   : > { %v1616_v54 = vmul.f32 %v3547_v44, %v3547_v44 }
  0xf2   : > { %v1217_v5 = vsel %vm645_vm9, %v1153_v55, 0.0  ;;  %1694 = vadd.xlane.f32.xlu2 %v1693_v34  ;;  %v941_v55 = vmul.f32 %v3408_v19, %v877_v38  ;;  %v1633_v38 = vmul.f32 %v3603_v29, %v3603_v29 }
  0xf3   : > { %v976_v52 = vpop.permute.xlu2 %975  ;;  %1697 = vadd.xlane.f32.xlu1 %v1696_v50  ;;  %v1076_v41 = vpop.permute.xlu1 %1075  ;;  %v1654_v14 = vsel %vm1437_vm8, %v1616_v54, 0.0  ;;  %v855_v50 = vsub.f32 %v3221_v62, %v3243_v1 }
  0xf4   : > { %v1119_v8 = vmul.f32 %v3266_v18, %v976_v52  ;;  %1652 = vadd.xlane.f32.xlu0 %v1651_v45  ;;  %v809_v30 = vpop.permute.xlu0 %808  ;;  %v1705_v62 = vsel %vm1437_vm8, %v1633_v38, 0.0  ;;  %v3691_v38 = vld [vmem:[%s3441_s24 + $0xb0] sm:$0xff] }
  0xf5   : > { %v876_v24 = vsub.f32 %v809_v30, %v3315_v49  ;;  %v3647_v30 = vadd.s32 24, %v3240_v12 }
  0xf6   : > { %v3487_v63 = vld [vmem:[%s3255_s16 + $0xb8] sm:$0xff]  ;;  %v890_v4 = vld [vmem:[%s3255_s16 + $0x30] sm:$0xff] }
  0xf7   : > { %1269 = vst [vmem:[%s3280_s13 + $0xd8] sm:$0xff] %v1237_v10  ;;  %v922_v22 = vmul.f32 %v890_v4, %v858_v61  ;;  %v1139_v61 = vmul.f32 %v3335_v13, %v1076_v41  ;;  %v1617_v4 = vmul.f32 %v3555_v9, %v3555_v9  ;;  %v856_v10 = vsub.f32 %v3201_v47, %v3243_v1 }
  0xf8   : > { %1249 = vst [vmem:[%s3280_s13 + $0x38] sm:$0xff] %v1217_v5  ;;  %v940_v34 = vmul.f32 %v3446_v35, %v876_v24  ;;  %vm641_vm13 = vcmp.ne.s32.totalorder %v3647_v30, %v3263_v17 }
  0xf9   : > { %v1152_v33 = vadd.f32 %v1120_v3, %v922_v22  ;;  %v1171_v19 = vadd.f32 %v1139_v61, %v941_v55  ;;  %v1657_v47 = vsel %vm1437_vm8, %v1617_v4, 0.0  ;;  %v3599_v3 = vadd.s32 32, %v3240_v12  ;;  %v3643_v61 = vld [vmem:[%s3441_s24 + $0x30] sm:$0xff] }
  0xfa   : > { %1655 = vadd.xlane.f32.xlu2 %v1654_v14  ;;  %v1660_v4 = vsel %vm1437_vm8, %v1618_v58, 0.0  ;;  %v3695_v58 = vadd.s32 16, %v3240_v12 }
  0xfb   : > { %v1216_v20 = vsel %vm644_vm10, %v1152_v33, 0.0  ;;  %v1235_v23 = vsel %vm647_vm6, %v1171_v19, 0.0  ;;  %2939 = vmatpush.xpose.msk.msra.mxu1 %vm647_vm6, %v1171_v19  ;;  %v971_v33 = vpop.permute.xlu2 %970  ;;  %1658 = vadd.xlane.f32.xlu1 %v1657_v47  ;;  %v1071_v32 = vpop.permute.xlu1 %1070  ;;  %vm642_vm12 = vcmp.ne.s32.totalorder %v3599_v3, %v3263_v17  ;;  %v1620_v47 = vmul.f32 %v3651_v36, %v3651_v36 }
  0xfc   : > { %2940 = vmatpush.msk.msra.mxu3 %vm647_vm6, %v1171_v19  ;;  %1700 = vadd.xlane.f32.xlu0 %v1699_v28  ;;  %vm640_vm14 = vcmp.ne.s32.totalorder %v3695_v58, %v3263_v17 }
  0xff   : > { %v3534_v60 = vld [vmem:[%s3255_s16 + $0xb0] sm:$0xff]  ;;  %v889_v2 = vld [vmem:[%s3255_s16 + $0x28] sm:$0xff] }
 0x100   : > { %1268 = vst [vmem:[%s3280_s13 + $0xd0] sm:$0xff] %v1236_v37  ;;  %v921_v51 = vmul.f32 %v889_v2, %v857_v48  ;;  %v1632_v48 = vmul.f32 %v3595_v27, %v3595_v27  ;;  %v1118_v2 = vmul.f32 %v3266_v18, %v971_v33  ;;  %v804_v37 = vpop.permute.xlu0 %803 }
 0x101   : > { %1248 = vst [vmem:[%s3280_s13 + $0x30] sm:$0xff] %v1216_v20  ;;  %v1138_v20 = vmul.f32 %v3335_v13, %v1071_v32  ;;  %v875_v55 = vsub.f32 %v804_v37, %v3315_v49  ;;  %v1299_v37 = vld [vmem:[%s3280_s13 + $0x40] sm:$0xff] }
 0x102   : > { %v1151_v5 = vadd.f32 %v1119_v8, %v921_v51  ;;  %v1702_v45 = vsel %vm1437_vm8, %v1632_v48, 0.0  ;;  %v1300_v8 = vld [vmem:[%s3280_s13 + $0x48] sm:$0xff] }
 0x103   : > { %v1170_v35 = vadd.f32 %v1138_v20, %v940_v34  ;;  %1329 = vmatpush.xpose.msra.mxu0 %v1300_v8  ;;  %1369 = vmatpush.msra.mxu2 %v1300_v8  ;;  %v1066_v14 = vpop.permute.xlu1 %1065 }
 0x104   : > { %v1215_v22 = vsel %vm643_vm11, %v1151_v5, 0.0  ;;  %1703 = vadd.xlane.f32.xlu2 %v1702_v45  ;;  %v3657_v5 = vld [vmem:[%s3441_s24 + $0xa8] sm:$0xff]  ;;  %1706 = vadd.xlane.f32.xlu1 %v1705_v62  ;;  %v1137_v24 = vmul.f32 %v3335_v13, %v1066_v14  ;;  %v853_v14 = vsub.f32 %v3224_v0, %v3243_v1 }
 0x105   : > { %v1234_v54 = vsel %vm646_vm7, %v1170_v35, 0.0  ;;  %2941 = vmatpush.xpose.msk.msra.mxu1 %vm646_vm7, %v1170_v35  ;;  %2942 = vmatpush.msk.msra.mxu3 %vm646_vm7, %v1170_v35  ;;  %v1634_v25 = vmul.f32 %v3657_v5, %v3657_v5  ;;  %v3699_v35 = vld [vmem:[%s3441_s24 + $0xb8] sm:$0xff] }
 0x106   : > { %1661 = vadd.xlane.f32.xlu0 %v1660_v4  ;;  %1370 = vmatpush.msra.mxu2 %v1299_v37 }
 0x107   : > { %1330 = vmatpush.xpose.msra.mxu0 %v1299_v37 }
 0x108   : > { %v3582_v16 = vld [vmem:[%s3255_s16 + $0xa8] sm:$0xff]  ;;  %v888_v11 = vld [vmem:[%s3255_s16 + $0x20] sm:$0xff]  ;;  %v799_v53 = vpop.permute.xlu0 %798 }
 0x109   : > { %1267 = vst [vmem:[%s3280_s13 + $0xc8] sm:$0xff] %v1235_v23  ;;  %v920_v56 = vmul.f32 %v888_v11, %v856_v10  ;;  %v966_v10 = vpop.permute.xlu2 %965  ;;  %v1619_v11 = vmul.f32 %v3643_v61, %v3643_v61  ;;  %v874_v20 = vsub.f32 %v799_v53, %v3315_v49 }
 0x10a   : > { %1247 = vst [vmem:[%s3280_s13 + $0x28] sm:$0xff] %v1215_v22  ;;  %v939_v22 = vmul.f32 %v3487_v63, %v875_v55  ;;  %v1117_v23 = vmul.f32 %v3266_v18, %v966_v10 }
 0x10b   : > { %v1150_v40 = vadd.f32 %v1118_v2, %v920_v56  ;;  %v854_v56 = vsub.f32 %v3215_v57, %v3243_v1  ;;  %v1663_v33 = vsel %vm1437_vm8, %v1619_v11, 0.0  ;;  %v1666_v57 = vsel %vm1437_vm8, %v1620_v47, 0.0 }
 0x10c   : > { %v1169_v63 = vadd.f32 %v1137_v24, %v939_v22  ;;  %1664 = vadd.xlane.f32.xlu2 %v1663_v33  ;;  %1667 = vadd.xlane.f32.xlu1 %v1666_v57  ;;  %v938_v55 = vmul.f32 %v3534_v60, %v874_v20  ;;  %v3747_v33 = vld [vmem:[%s3441_s24 + $0x50] sm:$0xff] }
 0x10d   : > { %v1214_v41 = vsel %vm642_vm12, %v1150_v40, 0.0  ;;  %v1708_v40 = vsel %vm1437_vm8, %v1634_v25, 0.0  ;;  %v1298_v25 = vld [vmem:[%s3280_s13 + $0x38] sm:$0xff] }
 0x10e   : > { %v1233_v2 = vsel %vm645_vm9, %v1169_v63, 0.0  ;;  %2943 = vmatpush.xpose.msk.msra.mxu1 %vm645_vm9, %v1169_v63  ;;  %2944 = vmatpush.msk.msra.mxu3 %vm645_vm9, %v1169_v63  ;;  %v3743_v63 = vadd.s32 8, %v3240_v12 }
 0x10f   : > { %1709 = vadd.xlane.f32.xlu0 %v1708_v40  ;;  %1331 = vmatpush.xpose.msra.mxu0 %v1298_v25 }
 0x110   : > { %v794_v4 = vpop.permute.xlu0 %793  ;;  %1371 = vmatpush.msra.mxu2 %v1298_v25  ;;  %vm639_vm15 = vcmp.ne.s32.totalorder %v3743_v63, %v3263_v17 }
 0x111   : > { %v3630_v51 = vld [vmem:[%s3255_s16 + $0xa0] sm:$0xff]  ;;  %v887_v52 = vld [vmem:[%s3255_s16 + $0x18] sm:$0xff]  ;;  %v873_v47 = vsub.f32 %v794_v4, %v3315_v49 }
 0x112   : > { %1266 = vst [vmem:[%s3280_s13 + $0xc0] sm:$0xff] %v1234_v54  ;;  %v919_v19 = vmul.f32 %v887_v52, %v855_v50  ;;  %v3705_v50 = vld [vmem:[%s3441_s24 + $0x40] sm:$0xff]  ;;  %v961_v52 = vpop.permute.xlu2 %960  ;;  %v1635_v54 = vmul.f32 %v3691_v38, %v3691_v38 }
 0x113   : > { %1246 = vst [vmem:[%s3280_s13 + $0x20] sm:$0xff] %v1214_v41  ;;  %v1061_v41 = vpop.permute.xlu1 %1060  ;;  %v1116_v8 = vmul.f32 %v3266_v18, %v961_v52  ;;  %v1621_v7 = vmul.f32 %v3705_v50, %v3705_v50  ;;  %v937_v57 = vmul.f32 %v3582_v16, %v873_v47 }
 0x114   : > { %v1149_v28 = vadd.f32 %v1117_v23, %v919_v19  ;;  %v1136_v62 = vmul.f32 %v3335_v13, %v1061_v41  ;;  %v1636_v19 = vmul.f32 %v3699_v35, %v3699_v35  ;;  %v1711_v11 = vsel %vm1437_vm8, %v1635_v54, 0.0 }
 0x115   : > { %1712 = vadd.xlane.f32.xlu2 %v1711_v11  ;;  %v1623_v41 = vmul.f32 %v3747_v33, %v3747_v33  ;;  %v3792_v11 = vld [vmem:[%s3441_s24 + $0xd0] sm:$0xff] }
 0x116   : > { %v1213_v34 = vsel %vm641_vm13, %v1149_v28, 0.0  ;;  %v1168_v60 = vadd.f32 %v1136_v62, %v938_v55  ;;  %v1714_v0 = vsel %vm1437_vm8, %v1636_v19, 0.0  ;;  %v3739_v28 = vld [vmem:[%s3441_s24 + $0x48] sm:$0xff]  ;;  %v852_v55 = vsub.f32 %v3218_v59, %v3243_v1 }
 0x117   : > { %1715 = vadd.xlane.f32.xlu1 %v1714_v0  ;;  %v1622_v37 = vmul.f32 %v3739_v28, %v3739_v28  ;;  %v1675_v59 = vsel %vm1437_vm8, %v1623_v41, 0.0  ;;  %v3787_v1 = vld [vmem:[%s3441_s24 + $0xc8] sm:$0xff] }
 0x118   : > { %v1232_v53 = vsel %vm644_vm10, %v1168_v60, 0.0  ;;  %2945 = vmatpush.xpose.msk.msra.mxu1 %vm644_vm10, %v1168_v60  ;;  %2946 = vmatpush.msk.msra.mxu3 %vm644_vm10, %v1168_v60  ;;  %v789_v52 = vpop.permute.xlu0 %788  ;;  %v1297_v60 = vld [vmem:[%s3280_s13 + $0x30] sm:$0xff]  ;;  %v1638_v25 = vmul.f32 %v3787_v1, %v3787_v1  ;;  %v1296_v41 = vld [vmem:[%s3280_s13 + $0x28] sm:$0xff] }
 0x119   : > { %1332 = vmatpush.xpose.msra.mxu0 %v1297_v60  ;;  %1372 = vmatpush.msra.mxu2 %v1297_v60 }
 0x11a   : > { %v3678_v32 = vld [vmem:[%s3255_s16 + $0x98] sm:$0xff]  ;;  %v886_v48 = vld [vmem:[%s3255_s16 + $0x10] sm:$0xff]  ;;  %v956_v20 = vpop.permute.xlu2 %955 }
 0x11b   : > { %1265 = vst [vmem:[%s3280_s13 + $0xb8] sm:$0xff] %v1233_v2  ;;  %v918_v45 = vmul.f32 %v886_v48, %v854_v56  ;;  %v1669_v56 = vsel %vm1437_vm8, %v1621_v7, 0.0  ;;  %v3753_v48 = vld [vmem:[%s3441_s24 + $0xc0] sm:$0xff]  ;;  %v1056_v2 = vpop.permute.xlu1 %1055  ;;  %1373 = vmatpush.msra.mxu2 %v1296_v41 }
 0x11c   : > { %1245 = vst [vmem:[%s3280_s13 + $0x18] sm:$0xff] %v1213_v34  ;;  %v1135_v40 = vmul.f32 %v3335_v13, %v1056_v2  ;;  %1670 = vadd.xlane.f32.xlu0 %v1669_v56  ;;  %v1637_v6 = vmul.f32 %v3753_v48, %v3753_v48 }
 0x11d   : > { %v1148_v10 = vadd.f32 %v1116_v8, %v918_v45  ;;  %v1115_v45 = vmul.f32 %v3266_v18, %v956_v20  ;;  %v1672_v8 = vsel %vm1437_vm8, %v1622_v37, 0.0  ;;  %v1639_v20 = vmul.f32 %v3792_v11, %v3792_v11  ;;  %1333 = vmatpush.xpose.msra.mxu0 %v1296_v41 }
 0x11e   : > { %v1167_v54 = vadd.f32 %v1135_v40, %v937_v57  ;;  %1673 = vadd.xlane.f32.xlu2 %v1672_v8  ;;  %v1720_v57 = vsel %vm1437_vm8, %v1638_v25, 0.0  ;;  %v3840_v8 = vld [vmem:[%s3441_s24 + $0xd8] sm:$0xff] }
 0x11f   : > { %v1212_v24 = vsel %vm640_vm14, %v1148_v10, 0.0  ;;  %v872_v10 = vsub.f32 %v789_v52, %v3315_v49  ;;  %1676 = vadd.xlane.f32.xlu1 %v1675_v59 }
 0x120   : > { %v1231_v19 = vsel %vm643_vm11, %v1167_v54, 0.0  ;;  %2947 = vmatpush.xpose.msk.msra.mxu1 %vm643_vm11, %v1167_v54  ;;  %2948 = vmatpush.msk.msra.mxu3 %vm643_vm11, %v1167_v54  ;;  %v784_v2 = vpop.permute.xlu0 %783  ;;  %v3829_v54 = vld [vmem:[%s3441_s24 + $0x60] sm:$0xff]  ;;  %vm2166_vm11 = vcmask 195712  }
 0x121   : > { %v936_v0 = vmul.f32 %v3630_v51, %v872_v10  ;;  %v871_v52 = vsub.f32 %v784_v2, %v3315_v49  ;;  %v3873_v2 = vld [vmem:[%s3441_s24 + $0x70] sm:$0xff] }
 0x122   : > { %v951_v47 = vpop.permute.xlu2 %950 }
 0x123   : > { %v3726_v22 = vld [vmem:[%s3255_s16 + $0x90] sm:$0xff]  ;;  %v885_v23 = vld [vmem:[%s3255_s16 + $0x8] sm:$0xff] }
 0x124   : > { %1264 = vst [vmem:[%s3280_s13 + $0xb0] sm:$0xff] %v1232_v53  ;;  %v917_v34 = vmul.f32 %v885_v23, %v853_v14  ;;  %v1717_v14 = vsel %vm1437_vm8, %v1637_v6, 0.0  ;;  %v3798_v23 = vld [vmem:[%s3441_s24 + $0x58] sm:$0xff]  ;;  %v1051_v53 = vpop.permute.xlu1 %1050  ;;  %v1723_v6 = vsel %vm1437_vm8, %v1639_v20, 0.0 }
 0x125   : > { %1244 = vst [vmem:[%s3280_s13 + $0x10] sm:$0xff] %v1212_v24  ;;  %v1134_v56 = vmul.f32 %v3335_v13, %v1051_v53  ;;  %1718 = vadd.xlane.f32.xlu0 %v1717_v14  ;;  %v1624_v46 = vmul.f32 %v3798_v23, %v3798_v23  ;;  %v1640_v14 = vmul.f32 %v3840_v8, %v3840_v8 }
 0x126   : > { %v1147_v16 = vadd.f32 %v1115_v45, %v917_v34  ;;  %v1114_v34 = vmul.f32 %v3266_v18, %v951_v47  ;;  %1721 = vadd.xlane.f32.xlu2 %v1720_v57  ;;  %v1295_v47 = vld [vmem:[%s3280_s13 + $0x20] sm:$0xff] }
 0x127   : > { %v1166_v37 = vadd.f32 %v1134_v56, %v936_v0  ;;  %1724 = vadd.xlane.f32.xlu1 %v1723_v6  ;;  %v3862_v0 = vld [vmem:[%s3441_s24 + $0xe0] sm:$0xff]  ;;  %1334 = vmatpush.xpose.msra.mxu0 %v1295_v47  ;;  %v1726_v56 = vsel %vm1437_vm8, %v1640_v14, 0.0  ;;  %v1294_v6 = vld [vmem:[%s3280_s13 + $0x18] sm:$0xff] }
 0x128   : > { %v1211_v7 = vsel %vm639_vm15, %v1147_v16, 0.0  ;;  %v1678_v16 = vsel %vm1437_vm8, %v1624_v46, 0.0  ;;  %v779_v60 = vpop.permute.xlu0 %778  ;;  %1374 = vmatpush.msra.mxu2 %v1295_v47  ;;  %v1641_v46 = vmul.f32 %v3862_v0, %v3862_v0 }
 0x129   : > { %v1230_v40 = vsel %vm642_vm12, %v1166_v37, 0.0  ;;  %2949 = vmatpush.xpose.msk.msra.mxu1 %vm642_vm12, %v1166_v37  ;;  %2950 = vmatpush.msk.msra.mxu3 %vm642_vm12, %v1166_v37 }
 0x12a   : > { %1375 = vmatpush.msra.mxu2 %v1294_v6 }
 0x12b   : > { %1335 = vmatpush.xpose.msra.mxu0 %v1294_v6 }
 0x12c   : > { %v3774_v62 = vld [vmem:[%s3255_s16 + $0x88] sm:$0xff]  ;;  %v884_v4 = vld [vmem:[%s3255_s16] sm:$0xff] }
 0x12d   : > { %1263 = vst [vmem:[%s3280_s13 + $0xa8] sm:$0xff] %v1231_v19  ;;  %v916_v24 = vmul.f32 %v884_v4, %v852_v55  ;;  %v3834_v55 = vld [vmem:[%s3441_s24 + $0x68] sm:$0xff]  ;;  %v1046_v4 = vpop.permute.xlu1 %1045  ;;  %v1625_v19 = vmul.f32 %v3829_v54, %v3829_v54  ;;  %1679 = vadd.xlane.f32.xlu0 %v1678_v16 }
 0x12e   : > { %1243 = vst [vmem:[%s3280_s13 + $0x8] sm:$0xff] %v1211_v7  ;;  %v935_v7 = vmul.f32 %v3678_v32, %v871_v52  ;;  %v1133_v10 = vmul.f32 %v3335_v13, %v1046_v4  ;;  %v1626_v59 = vmul.f32 %v3834_v55, %v3834_v55  ;;  %v870_v32 = vsub.f32 %v779_v60, %v3315_v49  ;;  %v3894_v4 = vld [vmem:[%s3441_s24 + $0x78] sm:$0xff] }
 0x12f   : > { %v1146_v51 = vadd.f32 %v1114_v34, %v916_v24  ;;  %v1681_v24 = vsel %vm1437_vm8, %v1625_v19, 0.0  ;;  %v3867_v34 = vld [vmem:[%s3441_s24 + $0xe8] sm:$0xff]  ;;  %v1729_v52 = vsel %vm1437_vm8, %v1641_v46, 0.0 }
 0x130   : > { %v1165_v3 = vadd.f32 %v1133_v10, %v935_v7  ;;  %v1684_v25 = vsel %vm1437_vm8, %v1626_v59, 0.0  ;;  %1682 = vadd.xlane.f32.xlu2 %v1681_v24  ;;  %v934_v37 = vmul.f32 %v3726_v22, %v870_v32  ;;  %v774_v57 = vpop.permute.xlu0 %773  ;;  %v1434_v7 = vld [vmem:[%s3441_s24 + $0xf8] sm:$0xff]  ;;  %v1433_v10 = vld [vmem:[%s3441_s24 + $0xf0] sm:$0xff]  ;;  %v1628_v59 = vmul.f32 %v3894_v4, %v3894_v4 }
 0x131   : > { %v1210_v45 = vsel %vm638_vm0, %v1146_v51, 0.0  ;;  %1685 = vadd.xlane.f32.xlu1 %v1684_v25  ;;  %v869_v41 = vsub.f32 %v774_v57, %v3315_v49  ;;  %v1643_v32 = vmul.f32 %v1433_v10, %v1433_v10 }
 0x132   : > { %v1229_v53 = vsel %vm641_vm13, %v1165_v3, 0.0  ;;  %2951 = vmatpush.xpose.msk.msra.mxu1 %vm641_vm13, %v1165_v3  ;;  %2952 = vmatpush.msk.msra.mxu3 %vm641_vm13, %v1165_v3  ;;  %v1690_v58 = vsel %vm1437_vm8, %v1628_v59, 0.0 }
 0x133   : > { %v933_v14 = vmul.f32 %v3774_v62, %v869_v41 }
 0x135   : > { %v3817_v18 = vld [vmem:[%s3255_s16 + $0x80] sm:$0xff]  ;;  %v1041_v20 = vpop.permute.xlu1 %1040  ;;  %1727 = vadd.xlane.f32.xlu0 %v1726_v56  ;;  %v1293_v56 = vld [vmem:[%s3280_s13 + $0x10] sm:$0xff]  ;;  %v1292_v41 = vld [vmem:[%s3280_s13 + $0x8] sm:$0xff] }
 0x136   : > { %1262 = vst [vmem:[%s3280_s13 + $0xa0] sm:$0xff] %v1230_v40  ;;  %v1132_v51 = vmul.f32 %v3335_v13, %v1041_v20  ;;  %v1642_v40 = vmul.f32 %v3867_v34, %v3867_v34  ;;  %v3923_v20 = vld [vmem:[%s557_s14] sm:$0xf]  ;;  %1336 = vmatpush.xpose.msra.mxu0 %v1293_v56  ;;  %1376 = vmatpush.msra.mxu2 %v1293_v56 }
 0x137   : > { %1242 = vst [vmem:[%s3280_s13] sm:$0xff] %v1210_v45  ;;  %v1627_v45 = vmul.f32 %v3873_v2, %v3873_v2 }
 0x138   : > { %1261 = vst [vmem:[%s3280_s13 + $0x98] sm:$0xff] %v1229_v53  ;;  %v1164_v30 = vadd.f32 %v1132_v51, %v934_v37  ;;  %v1732_v16 = vsel %vm1437_vm8, %v1642_v40, 0.0  ;;  %1730 = vadd.xlane.f32.xlu2 %v1729_v52  ;;  %v769_v24 = vpop.permute.xlu0 %768  ;;  %v1644_v53 = vmul.f32 %v1434_v7, %v1434_v7  ;;  %v1735_v37 = vsel %vm1437_vm8, %v1643_v32, 0.0  ;;  %v3931_v51 = vld [vmem:[%s557_s14 + $0x4] sm:$0xf]  ;;  %1377 = vmatpush.msra.mxu2 %v1292_v41  ;;  %s4710_s14 = scalar_lea.vmem %s4773_s9, %s4799_s29 }
 0x139   : > { %v1687_v19 = vsel %vm1437_vm8, %v1627_v45, 0.0  ;;  %1733 = vadd.xlane.f32.xlu1 %v1732_v16  ;;  %v868_v46 = vsub.f32 %v769_v24, %v3315_v49  ;;  %v1580_v49 = vmul.f32 %v3923_v20, %v3923_v20 }
 0x13a   : > { %v1228_v22 = vsel %vm640_vm14, %v1164_v30, 0.0  ;;  %2953 = vmatpush.xpose.msk.msra.mxu1 %vm640_vm14, %v1164_v30  ;;  %2954 = vmatpush.msk.msra.mxu3 %vm640_vm14, %v1164_v30  ;;  %v1738_v62 = vsel %vm1437_vm8, %v1644_v53, 0.0  ;;  %v1581_v30 = vmul.f32 %v3931_v51, %v3931_v51  ;;  %v4078_v53 = vadd.s32 4294967272, %v3263_v17 }
 0x13b   : > { %1260 = vst [vmem:[%s3280_s13 + $0x90] sm:$0xff] %v1228_v22  ;;  %v932_v40 = vmul.f32 %v3817_v18, %v868_v46  ;;  %v1583_v22 = vsel %vm1582_vm1, %v1580_v49, 0.0  ;;  %1337 = vmatpush.xpose.msra.mxu0 %v1292_v41 }
 0x13c   : > { %v1586_v6 = vsel %vm1582_vm1, %v1581_v30, 0.0 }
 0x13d   : > { %v1036_v60 = vpop.permute.xlu1 %1035  ;;  %1688 = vadd.xlane.f32.xlu0 %v1687_v19 }
 0x13e   : > { %v1131_v3 = vmul.f32 %v3335_v13, %v1036_v60 }
 0x140   : > { %v1163_v47 = vadd.f32 %v1131_v3, %v933_v14  ;;  %1691 = vadd.xlane.f32.xlu2 %v1690_v58  ;;  %v1031_v57 = vpop.permute.xlu0 %1030  ;;  %v4072_v14 = vadd.s32 4294967280, %v3263_v17 }
 0x141   : > { %1739 = vadd.xlane.f32.xlu1 %v1738_v62  ;;  %v1130_v45 = vmul.f32 %v3335_v13, %v1031_v57  ;;  %v1291_v13 = vld [vmem:[%s3280_s13] sm:$0xff] }
 0x142   : > { %v1227_v25 = vsel %vm639_vm15, %v1163_v47, 0.0  ;;  %2955 = vmatpush.xpose.msk.msra.mxu1 %vm639_vm15, %v1163_v47  ;;  %2956 = vmatpush.msk.msra.mxu3 %vm639_vm15, %v1163_v47  ;;  %vm2170_vm15 = vcmask 261312  }
 0x143   : > { %1259 = vst [vmem:[%s3280_s13 + $0x88] sm:$0xff] %v1227_v25  ;;  %v1162_v52 = vadd.f32 %v1130_v45, %v932_v40  ;;  %1338 = vmatpush.xpose.msra.mxu0 %v1291_v13  ;;  %1378 = vmatpush.msra.mxu2 %v1291_v13 }
 0x145   : > { %1736 = vadd.xlane.f32.xlu0 %v1735_v37  ;;  %v1226_v63 = vsel %vm638_vm0, %v1162_v52, 0.0  ;;  %2958 = vmatpush.msk.msra.mxu3 %vm638_vm0, %v1162_v52 }
 0x146   : > { %1258 = vst [vmem:[%s3280_s13 + $0x80] sm:$0xff] %v1226_v63  ;;  %2957 = vmatpush.xpose.msk.msra.mxu1 %vm638_vm0, %v1162_v52  ;;  %2737 = vmatpush.xpose.msk.msrb.mxu2 %vm1437_vm8, %v3894_v4  ;;  %s3969_s13 = scalar_lea.vmem %s4771_s7, %s3904_s30 }
 0x147   : > { %2754 = vmatpush.xpose.msk.msrb.mxu3 %vm1437_vm8, %v1434_v7  ;;  %2390 = vmatpush.msrb.mxu0 %v3894_v4  ;;  %v3979_v12 = vld [vmem:[%s3969_s13] sm:$0xf]  ;;  %v2126_v18 = vld [vmem:[%s3969_s13 + $0x4] sm:$0xf] }
 0x148   : > { %1584 = vadd.xlane.f32.xlu2 %v1583_v22 }
 0x149   : > { %2391 = vmatpush.msrb.mxu0 %v3873_v2 }
 0x14a   : > { %2410 = vmatpush.msrb.mxu1 %v1434_v7  ;;  %2738 = vmatpush.xpose.msk.msrb.mxu2 %vm1437_vm8, %v3873_v2 }
 0x14b   : > { %2755 = vmatpush.xpose.msk.msrb.mxu3 %vm1437_vm8, %v1433_v10  ;;  %2392 = vmatpush.msrb.mxu0 %v3834_v55 }
 0x14c   : > { %2411 = vmatpush.msrb.mxu1 %v1433_v10 }
 0x14d   : > { %1587 = vadd.xlane.f32.xlu0 %v1586_v6  ;;  %2393 = vmatpush.msrb.mxu0 %v3829_v54 }
 0x14e   : > { %2412 = vmatpush.msrb.mxu1 %v3867_v34  ;;  %2739 = vmatpush.xpose.msk.msrb.mxu2 %vm1437_vm8, %v3834_v55 }
 0x14f   : > { %2756 = vmatpush.xpose.msk.msrb.mxu3 %vm1437_vm8, %v3867_v34  ;;  %2394 = vmatpush.msrb.mxu0 %v3798_v23  ;;  %v4054_v34 = vadd.s32 4294967288, %v3263_v17 }
 0x150   : > { %2413 = vmatpush.msrb.mxu1 %v3862_v0 }
 0x151   : > { %2395 = vmatpush.msrb.mxu0 %v3747_v33 }
 0x152   : > { %2414 = vmatpush.msrb.mxu1 %v3840_v8  ;;  %2740 = vmatpush.xpose.msk.msrb.mxu2 %vm1437_vm8, %v3829_v54 }
 0x153   : > { %2757 = vmatpush.xpose.msk.msrb.mxu3 %vm1437_vm8, %v3862_v0  ;;  %2396 = vmatpush.msrb.mxu0 %v3739_v28 }
 0x154   : > { %2415 = vmatpush.msrb.mxu1 %v3792_v11 }
 0x155   : > { %2397 = vmatpush.msrb.mxu0 %v3705_v50 }
 0x156   : > { %2416 = vmatpush.msrb.mxu1 %v3787_v1  ;;  %2741 = vmatpush.xpose.msk.msrb.mxu2 %vm1437_vm8, %v3798_v23 }
 0x157   : > { %2758 = vmatpush.xpose.msk.msrb.mxu3 %vm1437_vm8, %v3840_v8  ;;  %2398 = vmatpush.msrb.mxu0 %v3651_v36 }
 0x158   : > { %2417 = vmatpush.msrb.mxu1 %v3753_v48 }
 0x159   : > { %2399 = vmatpush.msrb.mxu0 %v3643_v61 }
 0x15a   : > { %2295 = vperm.xlu1 %2829, %v3979_v12   ;;  %2418 = vmatpush.msrb.mxu1 %v3699_v35 }
 0x15b   : > { %2759 = vmatpush.xpose.msk.msrb.mxu3 %vm1437_vm8, %v3792_v11  ;;  %2742 = vmatpush.xpose.msk.msrb.mxu2 %vm1437_vm8, %v3747_v33  ;;  %v1290_v33 = vld [vmem:[%s4023_s15 + $0x4] sm:$0xf] }
 0x15c   : > { %2419 = vmatpush.msrb.mxu1 %v3691_v38  ;;  %2400 = vmatpush.msrb.mxu0 %v3609_v31 }
 0x15d   : > { %v4006_v54 = vpop.xlane.xlu2 %1649  ;;  %1359 = vmatmul.f32.vlgmr.msra.gmra.mxu1 %v1290_v33  ;;  %1399 = vmatmul.f32.vlgmr.msra.gmra.mxu3 %v1290_v33 }
 0x15e   : > { %2420 = vmatpush.msrb.mxu1 %v3657_v5  ;;  %2840 = vrsqrt.f32 %v4006_v54  ;;  %v4010_v11 = vpop.xlane.xlu1 %1646  ;;  %2401 = vmatpush.msrb.mxu0 %v3555_v9  ;;  %vm1760_vm2 = vcmp.eq.f32.partialorder %v4006_v54, inf  ;;  %vm1762_vm4 = vcmp.eq.f32.partialorder %v4006_v54, 0.0 }
 0x15f   : > { %2760 = vmatpush.xpose.msk.msrb.mxu3 %vm1437_vm8, %v3787_v1  ;;  %2842 = vrsqrt.f32 %v4010_v11  ;;  %2743 = vmatpush.xpose.msk.msrb.mxu2 %vm1437_vm8, %v3739_v28  ;;  %vm1748_vm5 = vcmp.eq.f32.partialorder %v4010_v11, inf  ;;  %vm1750_vm6 = vcmp.eq.f32.partialorder %v4010_v11, 0.0  ;;  %v1751_v19 = vand.u32 2147483648, %v4010_v11 }
 0x160   : > { %2300 = vperm.xlu2 %2830, %v2126_v18   ;;  %2421 = vmatpush.msrb.mxu1 %v3603_v29 }
 0x161   : > { %2402 = vmatpush.msrb.mxu0 %v3547_v44 }
 0x162   : > { %2422 = vmatpush.msrb.mxu1 %v3595_v27 }
 0x163   : > { %2761 = vmatpush.xpose.msk.msrb.mxu3 %vm1437_vm8, %v3753_v48  ;;  %2403 = vmatpush.msrb.mxu0 %v3513_v21 }
 0x164   : > { %2423 = vmatpush.msrb.mxu1 %v3561_v26  ;;  %v2841_v1 = vpop.eup %2840  ;;  %2744 = vmatpush.xpose.msk.msrb.mxu2 %vm1437_vm8, %v3705_v50 }
 0x165   : > { %v2843_v48 = vpop.eup %2842  ;;  %v1754_v23 = vmul.f32 %v2841_v1, %v4006_v54  ;;  %v4035_v55 = vpop.xlane.xlu2 %1694  ;;  %2404 = vmatpush.msrb.mxu0 %v3458_v42  ;;  %v1289_v42 = vld [vmem:[%s4023_s15] sm:$0xf] }
 0x166   : > { %2424 = vmatpush.msrb.mxu1 %v3507_v39  ;;  %v1742_v39 = vmul.f32 %v2843_v48, %v4010_v11  ;;  %2844 = vrsqrt.f32 %v4035_v55  ;;  %v4040_v28 = vpop.xlane.xlu1 %1697  ;;  %1379 = vmatmul.f32.vlgmr.msra.gmra.mxu2 %v1289_v42  ;;  %vm1940_vm7 = vcmp.eq.f32.partialorder %v4035_v55, inf  ;;  %vm1942_vm9 = vcmp.eq.f32.partialorder %v4035_v55, 0.0 }
 0x167   : > { %2762 = vmatpush.xpose.msk.msrb.mxu3 %vm1437_vm8, %v3699_v35  ;;  %v1755_v8 = vmul.f32 %v2841_v1, %v1754_v23  ;;  %2846 = vrsqrt.f32 %v4040_v28  ;;  %v4044_v35 = vpop.xlane.xlu0 %1652  ;;  %2405 = vmatpush.msrb.mxu0 %v3465_v43  ;;  %v1943_v37 = vand.u32 2147483648, %v4035_v55  ;;  %vm1952_vm10 = vcmp.eq.f32.partialorder %v4040_v28, inf }
 0x168   : > { %2425 = vmatpush.msrb.mxu1 %v3500_v15  ;;  %v1743_v21 = vmul.f32 %v2843_v48, %v1742_v39  ;;  %2848 = vrsqrt.f32 %v4044_v35  ;;  %2745 = vmatpush.xpose.msk.msrb.mxu2 %vm1437_vm8, %v3651_v36  ;;  %vm1954_vm12 = vcmp.eq.f32.partialorder %v4040_v28, 0.0  ;;  %vm1772_vm13 = vcmp.eq.f32.partialorder %v4044_v35, inf }
 0x169   : > { %v1756_v0 = vmul.f32 0.5, %v1755_v8  ;;  %1339 = vmatmul.f32.vlgmr.msra.gmra.mxu0 %v1289_v42  ;;  %vm1774_vm14 = vcmp.eq.f32.partialorder %v4044_v35, 0.0  ;;  %v1775_v8 = vand.u32 2147483648, %v4044_v35 }
 0x16a   : > { %v1744_v15 = vmul.f32 0.5, %v1743_v21 }
 0x16b   : > { %2763 = vmatpush.xpose.msk.msrb.mxu3 %vm1437_vm8, %v3691_v38  ;;  %v1757_v2 = vsub.f32 1.5, %v1756_v0  ;;  %v1763_v38 = vand.u32 2147483648, %v4006_v54 }
 0x16c   : > { %v2845_v50 = vpop.eup %2844  ;;  %v1745_v16 = vsub.f32 1.5, %v1744_v15  ;;  %2746 = vmatpush.xpose.msk.msrb.mxu2 %vm1437_vm8, %v3643_v61 }
 0x16d   : > { %v2847_v43 = vpop.eup %2846  ;;  %v1758_v4 = vmul.f32 %v2841_v1, %v1757_v2  ;;  %v1934_v36 = vmul.f32 %v2845_v50, %v4035_v55  ;;  %v4068_v7 = vpop.xlane.xlu2 %1655 }
 0x16e   : > { %v2849_v10 = vpop.eup %2848  ;;  %v1746_v60 = vmul.f32 %v2843_v48, %v1745_v16  ;;  %v1946_v59 = vmul.f32 %v2847_v43, %v4040_v28  ;;  %2850 = vrsqrt.f32 %v4068_v7  ;;  %v4080_v32 = vpop.xlane.xlu1 %1658  ;;  %vm1784_vm0 = vcmp.eq.f32.partialorder %v4068_v7, inf }
 0x16f   : > { %2764 = vmatpush.xpose.msk.msrb.mxu3 %vm1437_vm8, %v3657_v5  ;;  %v1759_v5 = vmul.f32 %v1758_v4, %v4006_v54  ;;  %v1935_v3 = vmul.f32 %v2845_v50, %v1934_v36  ;;  %v1766_v24 = vmul.f32 %v2849_v10, %v4044_v35  ;;  %2852 = vrsqrt.f32 %v4080_v32  ;;  %v4102_v30 = vpop.xlane.xlu0 %1700 }
 0x170   : > { %v1747_v47 = vmul.f32 %v1746_v60, %v4010_v11  ;;  %v1947_v58 = vmul.f32 %v2847_v43, %v1946_v59  ;;  %2747 = vmatpush.xpose.msk.msrb.mxu2 %vm1437_vm8, %v3609_v31  ;;  %2854 = vrsqrt.f32 %v4102_v30  ;;  %v2920_v60 = vld [vmem:[%s3441_s24 + $0x88] sm:$0xff]  ;;  %vm1786_vm1 = vcmp.eq.f32.partialorder %v4068_v7, 0.0 }
 0x171   : > { %v1761_v25 = vsel %vm1760_vm2, %v4006_v54, %v1759_v5  ;;  %v1936_v56 = vmul.f32 0.5, %v1935_v3  ;;  %v1767_v62 = vmul.f32 %v2849_v10, %v1766_v24  ;;  %v4157_v5 = vadd.s32 4294967264, %v3263_v17 }
 0x172   : > { %v1764_v61 = vsel %vm1762_vm4, %v1763_v38, %v1761_v25  ;;  %v1749_v46 = vsel %vm1748_vm5, %v4010_v11, %v1747_v47  ;;  %v1948_v49 = vmul.f32 0.5, %v1947_v58  ;;  %v1955_v11 = vand.u32 2147483648, %v4040_v28 }
 0x173   : > { %2765 = vmatpush.xpose.msk.msrb.mxu3 %vm1437_vm8, %v3603_v29  ;;  %v2161_v29 = vperm.slane %v1764_v61, %v4054_v34  ;;  %v1752_v57 = vsel %vm1750_vm6, %v1751_v19, %v1749_v46  ;;  %v1937_v40 = vsub.f32 1.5, %v1936_v56  ;;  %v1768_v45 = vmul.f32 0.5, %v1767_v62  ;;  %v2921_v62 = vld [vmem:[%s3441_s24 + $0x10] sm:$0xff] }
 0x174   : > { %v2851_v52 = vpop.eup %2850  ;;  %v2159_v22 = vperm.slane %v1752_v57, %v3263_v17  ;;  %v1949_v41 = vsub.f32 1.5, %v1948_v49  ;;  %2748 = vmatpush.xpose.msk.msrb.mxu2 %vm1437_vm8, %v3555_v9  ;;  %v1787_v3 = vand.u32 2147483648, %v4068_v7  ;;  %vm1796_vm2 = vcmp.eq.f32.partialorder %v4080_v32, inf  ;;  %v2922_v49 = vld [vmem:[%s3441_s24 + $0x80] sm:$0xff] }
 0x175   : > { %v1938_v63 = vmul.f32 %v2845_v50, %v1937_v40  ;;  %v1769_v6 = vsub.f32 1.5, %v1768_v45  ;;  %v1778_v13 = vmul.f32 %v2851_v52, %v4068_v7  ;;  %v2853_v18 = vpop.eup %2852  ;;  %v1799_v57 = vand.u32 2147483648, %v4080_v32 }
 0x176   : > { %v2163_v31 = vsel %vm2162_vm3, %v2161_v29, %v2159_v22  ;;  %v1950_v54 = vmul.f32 %v2847_v43, %v1949_v41  ;;  %v2855_v42 = vpop.eup %2854  ;;  %vm2174_vm4 = vcmask 326912   ;;  %vm1964_vm5 = vcmp.eq.f32.partialorder %v4102_v30, inf }
 0x177   : > { %2766 = vmatpush.xpose.msk.msrb.mxu3 %vm1437_vm8, %v3595_v27  ;;  %v1939_v33 = vmul.f32 %v1938_v63, %v4035_v55  ;;  %v1770_v1 = vmul.f32 %v2849_v10, %v1769_v6  ;;  %v1779_v48 = vmul.f32 %v2851_v52, %v1778_v13  ;;  %v1790_v27 = vmul.f32 %v2853_v18, %v4080_v32  ;;  %v4118_v23 = vpop.xlane.xlu2 %1703  ;;  %v4132_v9 = vpop.xlane.xlu1 %1706 }
 0x178   : > { %v1951_v39 = vmul.f32 %v1950_v54, %v4040_v28  ;;  %2856 = vrsqrt.f32 %v4118_v23  ;;  %2749 = vmatpush.xpose.msk.msrb.mxu2 %vm1437_vm8, %v3547_v44  ;;  %v1958_v10 = vmul.f32 %v2855_v42, %v4102_v30  ;;  %vm1966_vm6 = vcmp.eq.f32.partialorder %v4102_v30, 0.0 }
 0x179   : > { %v1941_v21 = vsel %vm1940_vm7, %v4035_v55, %v1939_v33  ;;  %v1771_v0 = vmul.f32 %v1770_v1, %v4044_v35  ;;  %v1780_v15 = vmul.f32 0.5, %v1779_v48  ;;  %v1791_v2 = vmul.f32 %v2853_v18, %v1790_v27  ;;  %v4159_v44 = vpop.xlane.xlu0 %1661 }
 0x17a   : > { %v1944_v50 = vsel %vm1942_vm9, %v1943_v37, %v1941_v21  ;;  %v1953_v38 = vsel %vm1952_vm10, %v4040_v28, %v1951_v39  ;;  %2858 = vrsqrt.f32 %v4132_v9  ;;  %v1959_v47 = vmul.f32 %v2855_v42, %v1958_v10 }
 0x17b   : > { %2767 = vmatpush.xpose.msk.msrb.mxu3 %vm1437_vm8, %v3561_v26  ;;  %v2220_v26 = vperm.slane %v1944_v50, %v3263_v17  ;;  %v1956_v16 = vsel %vm1954_vm12, %v1955_v11, %v1953_v38  ;;  %v1773_v43 = vsel %vm1772_vm13, %v4044_v35, %v1771_v0  ;;  %v1781_v4 = vsub.f32 1.5, %v1780_v15 }
 0x17c   : > { %v2221_v55 = vperm.slane %v1956_v16, %v4054_v34  ;;  %v1776_v19 = vsel %vm1774_vm14, %v1775_v8, %v1773_v43  ;;  %v1792_v36 = vmul.f32 0.5, %v1791_v2  ;;  %2750 = vmatpush.xpose.msk.msrb.mxu2 %vm1437_vm8, %v2921_v62  ;;  %v1960_v37 = vmul.f32 0.5, %v1959_v47 }
 0x17d   : > { %v2165_v28 = vperm.slane %v1776_v19, %v4072_v14  ;;  %v1782_v59 = vmul.f32 %v2851_v52, %v1781_v4  ;;  %2860 = vrsqrt.f32 %v4159_v44  ;;  %v1967_v11 = vand.u32 2147483648, %v4102_v30 }
 0x17e   : > { %v2857_v34 = vpop.eup %2856  ;;  %v4162_v35 = vsel %vm2162_vm3, %v2221_v55, %v2220_v26  ;;  %v1793_v24 = vsub.f32 1.5, %v1792_v36  ;;  %vm1798_vm3 = vcmp.eq.f32.partialorder %v4080_v32, 0.0  ;;  %v1961_v63 = vsub.f32 1.5, %v1960_v37 }
 0x17f   : > { %2768 = vmatpush.xpose.msk.msrb.mxu3 %vm1437_vm8, %v2920_v60  ;;  %v2167_v58 = vsel %vm2166_vm11, %v2165_v28, %v2163_v31  ;;  %v1783_v25 = vmul.f32 %v1782_v59, %v4068_v7  ;;  %v1970_v56 = vmul.f32 %v2857_v34, %v4118_v23  ;;  %v4180_v52 = vpop.xlane.xlu2 %1664  ;;  %v2923_v31 = vld [vmem:[%s3441_s24 + $0x8] sm:$0xff]  ;;  %v4197_v39 = vpop.xlane.xlu1 %1667  ;;  %vm1976_vm7 = vcmp.eq.f32.partialorder %v4118_v23, inf }
 0x180   : > { %v2859_v61 = vpop.eup %2858  ;;  %v1794_v46 = vmul.f32 %v2853_v18, %v1793_v24  ;;  %2751 = vmatpush.xpose.msk.msrb.mxu2 %vm1437_vm8, %v2923_v31  ;;  %v1962_v54 = vmul.f32 %v2855_v42, %v1961_v63  ;;  %2862 = vrsqrt.f32 %v4180_v52  ;;  %v2924_v42 = vld [vmem:[%s3441_s24] sm:$0xff]  ;;  %v1979_v26 = vand.u32 2147483648, %v4118_v23  ;;  %s4776_s24 = sand.u32 1, %s3013_s18  }
 0x181   : > { %v1785_v29 = vsel %vm1784_vm0, %v4068_v7, %v1783_v25  ;;  %v1971_v40 = vmul.f32 %v2857_v34, %v1970_v56  ;;  %v1982_v45 = vmul.f32 %v2859_v61, %v4132_v9  ;;  %vm1978_vm9 = vcmp.eq.f32.partialorder %v4118_v23, 0.0  ;;  %s2714_s30 = sshll.u32 %s4776_s24, 3  ;;  %s4716_s24 = scalar_lea.vmem %s4775_s11, %s4799_s29 }
 0x182   : > { %v1788_v22 = vsel %vm1786_vm1, %v1787_v3, %v1785_v29  ;;  %v1795_v41 = vmul.f32 %v1794_v46, %v4080_v32  ;;  %v1963_v21 = vmul.f32 %v1962_v54, %v4102_v30  ;;  %v4204_v2 = vpop.xlane.xlu0 %1709  ;;  %vm1988_vm10 = vcmp.eq.f32.partialorder %v4132_v9, inf  ;;  %s4699_s16 = scalar_lea.vmem [#allocation2], %s2714_s30  ;;  %s2780_s29 = sshll.u32 %s3112_s21, 3 }
 0x183   : > { %2769 = vmatpush.xpose.msk.msrb.mxu3 %vm1437_vm8, %v2922_v49  ;;  %v2169_v6 = vperm.slane %v1788_v22, %v4078_v53  ;;  %v1972_v13 = vmul.f32 0.5, %v1971_v40  ;;  %v1983_v18 = vmul.f32 %v2859_v61, %v1982_v45  ;;  %v2861_v8 = vpop.eup %2860  ;;  %v1991_v19 = vand.u32 2147483648, %v4132_v9  ;;  %s2497_s25 = sshll.u32 %s4699_s16, 4  ;;  %s2496_s0 = scalar_lea.hbm %s4774_s10, %s2780_s29  ;;  %s2498_s25 = int_to_ptr.vmem [resolvable:$true] %s2497_s25 }
 0x184   : > { %v1797_v7 = vsel %vm1796_vm2, %v4080_v32, %v1795_v41  ;;  %v1802_v15 = vmul.f32 %v2861_v8, %v4159_v44  ;;  %2752 = vmatpush.xpose.msk.msrb.mxu2 %vm1437_vm8, %v2924_v42  ;;  %v1965_v38 = vsel %vm1964_vm5, %v4102_v30, %v1963_v21  ;;  %2864 = vrsqrt.f32 %v4197_v39  ;;  %s2499_s2 = sshll.u32 %s2496_s0, 4  ;;  %s2500_s2 = int_to_ptr.hbm [resolvable:$true] %s2499_s2 }
 0x185   : > { %v2171_v33 = vsel %vm2170_vm15, %v2169_v6, %v2167_v58  ;;  %v1800_v1 = vsel %vm1798_vm3, %v1799_v57, %v1797_v7  ;;  %v1973_v48 = vsub.f32 1.5, %v1972_v13  ;;  %v1984_v27 = vmul.f32 0.5, %v1983_v18  ;;  %s2973_s5 = sshra.s32 %s2500_s2, 4  ;;  %s2974_s5 = int_to_ptr.hbm [resolvable:$true] %s2973_s5 }
 0x186   : > { %2770 = vmatmul.msk.f32.vlgmr.msrb.gmra.mxu3 %vm1437_vm8, %v3931_v51  ;;  %v2173_v51 = vperm.slane %v1800_v1, %v4157_v5  ;;  %v1968_v16 = vsel %vm1966_vm6, %v1967_v11, %v1965_v38  ;;  %vm1990_vm12 = vcmp.eq.f32.partialorder %v4132_v9, 0.0  ;;  %v1803_v10 = vmul.f32 %v2861_v8, %v1802_v15  ;;  %v2863_v28 = vpop.eup %2862  ;;  %p2980_p0 = scmp.lt.s32.totalorder %s2974_s5, %s4774_s10 }
 0x187   : > { %v1974_v32 = vmul.f32 %v2857_v34, %v1973_v48  ;;  %v1985_v0 = vsub.f32 1.5, %v1984_v27  ;;  %v2223_v55 = vperm.slane %v1968_v16, %v4072_v14  ;;  %2753 = vmatmul.msk.f32.vlgmr.msrb.gmra.mxu2 %vm1437_vm8, %v3923_v20  ;;  %2866 = vrsqrt.f32 %v4204_v2 }
 0x188   : > { %v4209_v50 = vsel %vm2174_vm4, %v2173_v51, %v2171_v33  ;;  %v4227_v60 = vpop.xlane.xlu2 %1712  ;;  %v1804_v58 = vmul.f32 0.5, %v1803_v10  ;;  %v4260_v7 = vadd.s32 4294967256, %v3263_v17  ;;  %vm1808_vm8 = vcmp.eq.f32.partialorder %v4159_v44, inf }
 0x189   : > { %v1975_v43 = vmul.f32 %v1974_v32, %v4118_v23  ;;  %v1986_v4 = vmul.f32 %v2859_v61, %v1985_v0  ;;  %v2224_v14 = vsel %vm2166_vm11, %v2223_v55, %v4162_v35  ;;  %2868 = vrsqrt.f32 %v4227_v60 }
 0x18a   : > { %v4237_v56 = vpop.xlane.xlu1 %1715  ;;  %v2865_v62 = vpop.eup %2864  ;;  %v1805_v46 = vsub.f32 1.5, %v1804_v58  ;;  %vm1810_vm11 = vcmp.eq.f32.partialorder %v4159_v44, 0.0  ;;  %v1811_v32 = vand.u32 2147483648, %v4159_v44  ;;  %v4272_v0 = vadd.s32 4294967248, %v3263_v17 }
 0x18b   : > { %v1977_v30 = vsel %vm1976_vm7, %v4118_v23, %v1975_v43  ;;  %v1987_v36 = vmul.f32 %v1986_v4, %v4132_v9  ;;  %v1814_v23 = vmul.f32 %v2863_v28, %v4180_v52  ;;  %2870 = vrsqrt.f32 %v4237_v56 }
 0x18c   : > { %v1980_v59 = vsel %vm1978_vm9, %v1979_v26, %v1977_v30  ;;  %v1806_v45 = vmul.f32 %v2861_v8, %v1805_v46  ;;  %vm1820_vm13 = vcmp.eq.f32.partialorder %v4180_v52, inf  ;;  %vm1822_vm14 = vcmp.eq.f32.partialorder %v4180_v52, 0.0 }
 0x18d   : > { %v2225_v34 = vperm.slane %v1980_v59, %v4078_v53  ;;  %v1989_v20 = vsel %vm1988_vm10, %v4132_v9, %v1987_v36  ;;  %v1815_v25 = vmul.f32 %v2863_v28, %v1814_v23  ;;  %v1826_v53 = vmul.f32 %v2865_v62, %v4197_v39  ;;  %v2867_v61 = vpop.eup %2866 }
 0x18e   : > { %v1992_v3 = vsel %vm1990_vm12, %v1991_v19, %v1989_v20  ;;  %v1994_v49 = vmul.f32 %v2867_v61, %v4204_v2  ;;  %v1807_v11 = vmul.f32 %v1806_v45, %v4159_v44  ;;  %v1823_v38 = vand.u32 2147483648, %v4180_v52 }
 0x18f   : > { %v2226_v24 = vsel %vm2170_vm15, %v2225_v34, %v2224_v14  ;;  %v2227_v47 = vperm.slane %v1992_v3, %v4157_v5  ;;  %v4244_v9 = vpop.xlane.xlu0 %1670  ;;  %v1816_v37 = vmul.f32 0.5, %v1815_v25  ;;  %v1827_v5 = vmul.f32 %v2865_v62, %v1826_v53  ;;  %v2869_v40 = vpop.eup %2868 }
 0x190   : > { %2872 = vrsqrt.f32 %v4244_v9  ;;  %v1995_v29 = vmul.f32 %v2867_v61, %v1994_v49  ;;  %v2006_v13 = vmul.f32 %v2869_v40, %v4227_v60  ;;  %v1809_v16 = vsel %vm1808_vm8, %v4159_v44, %v1807_v11 }
 0x191   : > { %v4241_v35 = vsel %vm2174_vm4, %v2227_v47, %v2226_v24  ;;  %v4249_v57 = vpop.xlane.xlu2 %1673  ;;  %v1817_v22 = vsub.f32 1.5, %v1816_v37  ;;  %v1828_v41 = vmul.f32 0.5, %v1827_v5  ;;  %v4251_v63 = vpop.eup %2870  ;;  %v4287_v43 = vadd.s32 4294967240, %v3263_v17 }
 0x192   : > { %v1996_v6 = vmul.f32 0.5, %v1995_v29  ;;  %2874 = vrsqrt.f32 %v4249_v57  ;;  %v2018_v18 = vmul.f32 %v4251_v63, %v4237_v56  ;;  %v2007_v54 = vmul.f32 %v2869_v40, %v2006_v13  ;;  %v4264_v48 = vpop.xlane.xlu1 %1676 }
 0x193   : > { %v1818_v33 = vmul.f32 %v2863_v28, %v1817_v22  ;;  %v1829_v1 = vsub.f32 1.5, %v1828_v41  ;;  %2876 = vrsqrt.f32 %v4264_v48  ;;  %vm2178_vm15 = vcmask 392512  }
 0x194   : > { %v1997_v27 = vsub.f32 1.5, %v1996_v6  ;;  %v2008_v8 = vmul.f32 0.5, %v2007_v54  ;;  %v2019_v51 = vmul.f32 %v4251_v63, %v2018_v18  ;;  %vm1832_vm0 = vcmp.eq.f32.partialorder %v4197_v39, inf }
 0x195   : > { %v1830_v4 = vmul.f32 %v2865_v62, %v1829_v1  ;;  %v1819_v19 = vmul.f32 %v1818_v33, %v4180_v52  ;;  %vm1834_vm1 = vcmp.eq.f32.partialorder %v4197_v39, 0.0  ;;  %v1835_v59 = vand.u32 2147483648, %v4197_v39 }
 0x196   : > { %v4257_v31 = vpop.eup %2872  ;;  %v1998_v30 = vmul.f32 %v2867_v61, %v1997_v27  ;;  %v2009_v36 = vsub.f32 1.5, %v2008_v8  ;;  %v2020_v10 = vmul.f32 0.5, %v2019_v51  ;;  %vm2000_vm2 = vcmp.eq.f32.partialorder %v4204_v2, inf }
 0x197   : > { %v1838_v21 = vmul.f32 %v4257_v31, %v4244_v9  ;;  %vm2002_vm3 = vcmp.eq.f32.partialorder %v4204_v2, 0.0  ;;  %v2003_v34 = vand.u32 2147483648, %v4204_v2  ;;  %v1812_v23 = vsel %vm1810_vm11, %v1811_v32, %v1809_v16 }
 0x198   : > { %v4275_v15 = vpop.xlane.xlu0 %1718  ;;  %v4277_v42 = vpop.eup %2874  ;;  %v1831_v3 = vmul.f32 %v1830_v4, %v4197_v39  ;;  %vm2012_vm4 = vcmp.eq.f32.partialorder %v4227_v60, inf  ;;  %vm2182_vm5 = vcmask 458112   ;;  %v1821_v47 = vsel %vm1820_vm13, %v4180_v52, %v1819_v19 }
 0x199   : > { %v1839_v26 = vmul.f32 %v4257_v31, %v1838_v21  ;;  %v1850_v55 = vmul.f32 %v4277_v42, %v4249_v57  ;;  %v4299_v20 = vpop.xlane.xlu2 %1721  ;;  %2878 = vrsqrt.f32 %v4275_v15  ;;  %v4306_v24 = vpop.eup %2876  ;;  %v1999_v58 = vmul.f32 %v1998_v30, %v4204_v2 }
 0x19a   : > { %v2010_v25 = vmul.f32 %v2869_v40, %v2009_v36  ;;  %v2021_v62 = vsub.f32 1.5, %v2020_v10  ;;  %vm2014_vm6 = vcmp.eq.f32.partialorder %v4227_v60, 0.0  ;;  %v1862_v61 = vmul.f32 %v4306_v24, %v4264_v48  ;;  %v4328_v45 = vpop.xlane.xlu1 %1724 }
 0x19b   : > { %v1840_v28 = vmul.f32 0.5, %v1839_v26  ;;  %v1851_v14 = vmul.f32 %v4277_v42, %v1850_v55  ;;  %v2015_v46 = vand.u32 2147483648, %v4227_v60  ;;  %vm2024_vm7 = vcmp.eq.f32.partialorder %v4237_v56, inf }
 0x19c   : > { %v2027_v37 = vand.u32 2147483648, %v4237_v56  ;;  %v4319_v5 = vadd.s32 4294967232, %v3263_v17  ;;  %v2177_v49 = vperm.slane %v1812_v23, %v4260_v7  ;;  %v1824_v29 = vsel %vm1822_vm14, %v1823_v38, %v1821_v47 }
 0x19d   : > { %v1841_v44 = vsub.f32 1.5, %v1840_v28  ;;  %v1852_v53 = vmul.f32 0.5, %v1851_v14  ;;  %vm2186_vm9 = vcmask 523712   ;;  %v1833_v40 = vsel %vm1832_vm0, %v4197_v39, %v1831_v3 }
 0x19e   : > { %2880 = vrsqrt.f32 %v4299_v20  ;;  %v2001_v41 = vsel %vm2000_vm2, %v4204_v2, %v1999_v58  ;;  %v2011_v6 = vmul.f32 %v2010_v25, %v4227_v60  ;;  %v2022_v52 = vmul.f32 %v4251_v63, %v2021_v62 }
 0x19f   : > { %vm2026_vm10 = vcmp.eq.f32.partialorder %v4237_v56, 0.0  ;;  %v1863_v13 = vmul.f32 %v4306_v24, %v1862_v61  ;;  %v4339_v18 = vpop.eup %2878  ;;  %v1842_v54 = vmul.f32 %v4257_v31, %v1841_v44  ;;  %vm1844_vm12 = vcmp.eq.f32.partialorder %v4244_v9, inf }
 0x1a0   : > { %v4330_v22 = vpop.xlane.xlu0 %1679  ;;  %vm1846_vm8 = vcmp.eq.f32.partialorder %v4244_v9, 0.0  ;;  %v1853_v11 = vsub.f32 1.5, %v1852_v53  ;;  %v1847_v33 = vand.u32 2147483648, %v4244_v9  ;;  %v4346_v1 = vadd.s32 4294967224, %v3263_v17 }
 0x1a1   : > { %v2030_v63 = vmul.f32 %v4339_v18, %v4275_v15  ;;  %2882 = vrsqrt.f32 %v4328_v45  ;;  %v2179_v27 = vsel %vm2178_vm15, %v2177_v49, %v4209_v50  ;;  %v2181_v31 = vperm.slane %v1824_v29, %v4272_v0 }
 0x1a2   : > { %v1836_v8 = vsel %vm1834_vm1, %v1835_v59, %v1833_v40  ;;  %v2004_v51 = vsel %vm2002_vm3, %v2003_v34, %v2001_v41  ;;  %v2013_v21 = vsel %vm2012_vm4, %v4227_v60, %v2011_v6  ;;  %v2023_v32 = vmul.f32 %v2022_v52, %v4237_v56 }
 0x1a3   : > { %v1864_v38 = vmul.f32 0.5, %v1863_v13  ;;  %v2031_v26 = vmul.f32 %v4339_v18, %v2030_v63  ;;  %v4363_v16 = vpop.xlane.xlu2 %1682  ;;  %v1843_v4 = vmul.f32 %v1842_v54, %v4244_v9  ;;  %v1854_v39 = vmul.f32 %v4277_v42, %v1853_v11 }
 0x1a4   : > { %v2881_v50 = vpop.eup %2880  ;;  %vm1856_vm11 = vcmp.eq.f32.partialorder %v4249_v57, inf  ;;  %vm1858_vm13 = vcmp.eq.f32.partialorder %v4249_v57, 0.0  ;;  %v2185_v2 = vperm.slane %v1836_v8, %v4287_v43  ;;  %v1859_v55 = vand.u32 2147483648, %v4249_v57  ;;  %v4392_v47 = vpop.xlane.xlu1 %1685 }
 0x1a5   : > { %v2042_v19 = vmul.f32 %v2881_v50, %v4299_v20  ;;  %2884 = vrsqrt.f32 %v4330_v22  ;;  %v2183_v30 = vsel %vm2182_vm5, %v2181_v31, %v2179_v27  ;;  %v2229_v36 = vperm.slane %v2004_v51, %v4260_v7 }
 0x1a6   : > { %v2016_v10 = vsel %vm2014_vm6, %v2015_v46, %v2013_v21  ;;  %v4378_v42 = vadd.s32 4294967216, %v3263_v17  ;;  %v2025_v14 = vsel %vm2024_vm7, %v4237_v56, %v2023_v32  ;;  %vm2190_vm14 = vcmask 589312  }
 0x1a7   : > { %v4380_v28 = vpop.eup %2882  ;;  %v1865_v59 = vsub.f32 1.5, %v1864_v38  ;;  %v2032_v34 = vmul.f32 0.5, %v2031_v26  ;;  %v2043_v23 = vmul.f32 %v2881_v50, %v2042_v19  ;;  %v1845_v7 = vsel %vm1844_vm12, %v4244_v9, %v1843_v4 }
 0x1a8   : > { %v1855_v60 = vmul.f32 %v1854_v39, %v4249_v57  ;;  %v2054_v3 = vmul.f32 %v4380_v28, %v4328_v45  ;;  %2886 = vrsqrt.f32 %v4363_v16  ;;  %v4394_v58 = vpop.xlane.xlu0 %1727  ;;  %v2187_v25 = vsel %vm2186_vm9, %v2185_v2, %v2183_v30 }
 0x1a9   : > { %vm1868_vm0 = vcmp.eq.f32.partialorder %v4264_v48, inf  ;;  %v1871_v62 = vand.u32 2147483648, %v4264_v48  ;;  %v2044_v44 = vmul.f32 0.5, %v2043_v23  ;;  %v2230_v53 = vsel %vm2178_vm15, %v2229_v36, %v4241_v35 }
 0x1aa   : > { %v2231_v61 = vperm.slane %v2016_v10, %v4272_v0  ;;  %v2028_v46 = vsel %vm2026_vm10, %v2027_v37, %v2025_v14  ;;  %v2055_v49 = vmul.f32 %v4380_v28, %v2054_v3  ;;  %v1848_v40 = vsel %vm1846_vm8, %v1847_v33, %v1845_v7 }
 0x1ab   : > { %v4407_v29 = vpop.eup %2884  ;;  %vm2194_vm1 = vcmask 654912   ;;  %v1866_v41 = vmul.f32 %v4306_v24, %v1865_v59  ;;  %vm1870_vm2 = vcmp.eq.f32.partialorder %v4264_v48, 0.0  ;;  %v2033_v35 = vsub.f32 1.5, %v2032_v34  ;;  %v4423_v52 = vpop.xlane.xlu2 %1730 }
 0x1ac   : > { %2888 = vrsqrt.f32 %v4392_v47  ;;  %v1857_v56 = vsel %vm1856_vm11, %v4249_v57, %v1855_v60  ;;  %v2045_v0 = vsub.f32 1.5, %v2044_v44  ;;  %v2056_v37 = vmul.f32 0.5, %v2055_v49  ;;  %v4446_v2 = vpop.xlane.xlu1 %1733 }
 0x1ad   : > { %v1874_v6 = vmul.f32 %v4407_v29, %v4330_v22  ;;  %v2233_v9 = vperm.slane %v2028_v46, %v4287_v43  ;;  %vm2036_vm15 = vcmp.eq.f32.partialorder %v4275_v15, inf  ;;  %v2039_v24 = vand.u32 2147483648, %v4275_v15 }
 0x1ae   : > { %2890 = vrsqrt.f32 %v4394_v58  ;;  %v2887_v13 = vpop.eup %2886  ;;  %v2232_v54 = vsel %vm2182_vm5, %v2231_v61, %v2230_v53  ;;  %v2189_v11 = vperm.slane %v1848_v40, %v4319_v5  ;;  %vm2048_vm3 = vcmp.eq.f32.partialorder %v4299_v20, inf }
 0x1af   : > { %v1875_v33 = vmul.f32 %v4407_v29, %v1874_v6  ;;  %v1860_v43 = vsel %vm1858_vm13, %v1859_v55, %v1857_v56  ;;  %v1867_v63 = vmul.f32 %v1866_v41, %v4264_v48  ;;  %v2034_v27 = vmul.f32 %v4339_v18, %v2033_v35 }
 0x1b0   : > { %v1886_v31 = vmul.f32 %v2887_v13, %v4363_v16  ;;  %vm2038_vm4 = vcmp.eq.f32.partialorder %v4275_v15, 0.0  ;;  %v2046_v8 = vmul.f32 %v2881_v50, %v2045_v0  ;;  %vm2050_vm5 = vcmp.eq.f32.partialorder %v4299_v20, 0.0  ;;  %v4448_v55 = vpop.xlane.xlu0 %1688 }
 0x1b1   : > { %v2057_v51 = vsub.f32 1.5, %v2056_v37  ;;  %v1876_v21 = vmul.f32 0.5, %v1875_v33  ;;  %2892 = vrsqrt.f32 %v4423_v52  ;;  %v4438_v38 = vsel %vm2186_vm9, %v2233_v9, %v2232_v54 }
 0x1b2   : > { %v2889_v32 = vpop.eup %2888  ;;  %v2051_v57 = vand.u32 2147483648, %v4299_v20  ;;  %vm2060_vm6 = vcmp.eq.f32.partialorder %v4328_v45, inf  ;;  %v1887_v18 = vmul.f32 %v2887_v13, %v1886_v31  ;;  %v2191_v26 = vsel %vm2190_vm14, %v2189_v11, %v2187_v25 }
 0x1b3   : > { %v2193_v4 = vperm.slane %v1860_v43, %v4346_v1  ;;  %vm2198_vm7 = vcmask 720512   ;;  %v2063_v50 = vand.u32 2147483648, %v4328_v45  ;;  %v1898_v39 = vmul.f32 %v2889_v32, %v4392_v47  ;;  %v4497_v11 = vpop.xlane.xlu2 %1691 }
 0x1b4   : > { %v4450_v19 = vpop.eup %2890  ;;  %v1869_v30 = vsel %vm1868_vm0, %v4264_v48, %v1867_v63  ;;  %v2035_v36 = vmul.f32 %v2034_v27, %v4275_v15  ;;  %v1877_v10 = vsub.f32 1.5, %v1876_v21  ;;  %v1888_v14 = vmul.f32 0.5, %v1887_v18 }
 0x1b5   : > { %v2047_v59 = vmul.f32 %v2046_v8, %v4299_v20  ;;  %v2058_v34 = vmul.f32 %v4380_v28, %v2057_v51  ;;  %vm2062_vm9 = vcmp.eq.f32.partialorder %v4328_v45, 0.0  ;;  %v1899_v23 = vmul.f32 %v2889_v32, %v1898_v39 }
 0x1b6   : > { %v2066_v7 = vmul.f32 %v4450_v19, %v4394_v58  ;;  %v4462_v60 = vadd.s32 4294967208, %v3263_v17  ;;  %vm1880_vm10 = vcmp.eq.f32.partialorder %v4330_v22, inf  ;;  %v1889_v3 = vsub.f32 1.5, %v1888_v14 }
 0x1b7   : > { %2894 = vrsqrt.f32 %v4446_v2  ;;  %v4466_v25 = vpop.eup %2892  ;;  %v2195_v44 = vsel %vm2194_vm1, %v2193_v4, %v2191_v26  ;;  %v1872_v28 = vsel %vm1870_vm2, %v1871_v62, %v1869_v30  ;;  %v1900_v53 = vmul.f32 0.5, %v1899_v23 }
 0x1b8   : > { %v2067_v61 = vmul.f32 %v4450_v19, %v2066_v7  ;;  %v2037_v46 = vsel %vm2036_vm15, %v4275_v15, %v2035_v36  ;;  %v1878_v49 = vmul.f32 %v4407_v29, %v1877_v10  ;;  %vm1882_vm12 = vcmp.eq.f32.partialorder %v4330_v22, 0.0  ;;  %v4513_v21 = vpop.xlane.xlu0 %1736 }
 0x1b9   : > { %v1883_v40 = vand.u32 2147483648, %v4330_v22  ;;  %v2078_v41 = vmul.f32 %v4466_v25, %v4423_v52  ;;  %v2049_v48 = vsel %vm2048_vm3, %v4299_v20, %v2047_v59  ;;  %v2059_v62 = vmul.f32 %v2058_v34, %v4328_v45  ;;  %v4545_v34 = vpop.xlane.xlu1 %1739 }
 0x1ba   : > { %v1890_v35 = vmul.f32 %v2887_v13, %v1889_v3  ;;  %v2068_v56 = vmul.f32 0.5, %v2067_v61  ;;  %v2197_v0 = vperm.slane %v1872_v28, %v4378_v42  ;;  %v4488_v37 = vadd.s32 4294967200, %v3263_v17 }
 0x1bb   : > { %v1901_v29 = vsub.f32 1.5, %v1900_v53  ;;  %v2079_v6 = vmul.f32 %v4466_v25, %v2078_v41  ;;  %vm1892_vm8 = vcmp.eq.f32.partialorder %v4363_v16, inf  ;;  %vm1894_vm11 = vcmp.eq.f32.partialorder %v4363_v16, 0.0  ;;  %v4555_v3 = vpop.xlane.xlu2 %1584 }
 0x1bc   : > { %v1895_v9 = vand.u32 2147483648, %v4363_v16  ;;  %v4495_v54 = vadd.s32 4294967192, %v3263_v17  ;;  %v2040_v33 = vsel %vm2038_vm4, %v2039_v24, %v2037_v46  ;;  %v2052_v43 = vsel %vm2050_vm5, %v2051_v57, %v2049_v48 }
 0x1bd   : > { %v4499_v13 = vpop.eup %2894  ;;  %v1879_v63 = vmul.f32 %v1878_v49, %v4330_v22  ;;  %2896 = vrsqrt.f32 %v4448_v55  ;;  %v2061_v27 = vsel %vm2060_vm6, %v4328_v45, %v2059_v62  ;;  %v1891_v31 = vmul.f32 %v1890_v35, %v4363_v16 }
 0x1be   : > { %v2069_v8 = vsub.f32 1.5, %v2068_v56  ;;  %v2080_v51 = vmul.f32 0.5, %v2079_v6  ;;  %v2199_v15 = vsel %vm2198_vm7, %v2197_v0, %v2195_v44  ;;  %v1902_v24 = vmul.f32 %v2889_v32, %v1901_v29  ;;  %v4582_v6 = vld [vmem:[%s3969_s13 + $0x4] sm:$0xf] }
 0x1bf   : > { %vm1904_vm13 = vcmp.eq.f32.partialorder %v4392_v47, inf  ;;  %v2090_v20 = vmul.f32 %v4499_v13, %v4446_v2  ;;  %v2235_v57 = vperm.slane %v2040_v33, %v4319_v5  ;;  %vm2202_vm0 = vcmask 786112  }
 0x1c0   : > { %vm1906_vm2 = vcmp.eq.f32.partialorder %v4392_v47, 0.0  ;;  %v1907_v18 = vand.u32 2147483648, %v4392_v47  ;;  %v2237_v26 = vperm.slane %v2052_v43, %v4346_v1  ;;  %v2064_v4 = vsel %vm2062_vm9, %v2063_v50, %v2061_v27 }
 0x1c1   : > { %v1881_v32 = vsel %vm1880_vm10, %v4330_v22, %v1879_v63  ;;  %vm2206_vm15 = vcmask 851712   ;;  %vm2072_vm3 = vcmp.eq.f32.partialorder %v4394_v58, inf  ;;  %v3024_v39 = vmov 1  }
 0x1c2   : > { %2831 = vset.pattern.permute.xlu2 %v3024_v39  ;;  %v1893_v5 = vsel %vm1892_vm8, %v4363_v16, %v1891_v31  ;;  %v2070_v30 = vmul.f32 %v4450_v19, %v2069_v8  ;;  %v2081_v36 = vsub.f32 1.5, %v2080_v51  ;;  %2898 = vrsqrt.f32 %v4497_v11 }
 0x1c3   : > { %2355 = vperm.xlu2 %2831, %v3979_v12   ;;  %v2897_v45 = vpop.eup %2896  ;;  %v1903_v1 = vmul.f32 %v1902_v24, %v4392_v47  ;;  %vm2074_vm4 = vcmp.eq.f32.partialorder %v4394_v58, 0.0  ;;  %v2075_v50 = vand.u32 2147483648, %v4394_v58  ;;  %v2091_v10 = vmul.f32 %v4499_v13, %v2090_v20 }
 0x1c4   : > { %v2236_v14 = vsel %vm2190_vm14, %v2235_v57, %v4438_v38  ;;  %v2239_v59 = vperm.slane %v2064_v4, %v4378_v42  ;;  %v1884_v19 = vsel %vm1882_vm12, %v1883_v40, %v1881_v32  ;;  %v1910_v12 = vmul.f32 %v2897_v45, %v4448_v55  ;;  %v4565_v40 = vpop.xlane.xlu0 %1587 }
 0x1c5   : > { %v2238_v23 = vsel %vm2194_vm1, %v2237_v26, %v2236_v14  ;;  %v1896_v7 = vsel %vm1894_vm11, %v1895_v9, %v1893_v5  ;;  %vm2084_vm5 = vcmp.eq.f32.partialorder %v4423_v52, inf  ;;  %2900 = vrsqrt.f32 %v4513_v21 }
 0x1c6   : > { %v2071_v38 = vmul.f32 %v2070_v30, %v4394_v58  ;;  %v2082_v42 = vmul.f32 %v4466_v25, %v2081_v36  ;;  %vm2086_vm14 = vcmp.eq.f32.partialorder %v4423_v52, 0.0  ;;  %v1911_v22 = vmul.f32 %v2897_v45, %v1910_v12 }
 0x1c7   : > { %v2201_v44 = vperm.slane %v1884_v19, %v4462_v60  ;;  %v1905_v16 = vsel %vm1904_vm13, %v4392_v47, %v1903_v1  ;;  %v2092_v28 = vmul.f32 0.5, %v2091_v10  ;;  %2902 = vrsqrt.f32 %v4545_v34 }
 0x1c8   : > { %v2899_v53 = vpop.eup %2898  ;;  %v2240_v61 = vsel %vm2198_vm7, %v2239_v59, %v2238_v23  ;;  %v2205_v25 = vperm.slane %v1896_v7, %v4488_v37  ;;  %v2087_v46 = vand.u32 2147483648, %v4423_v52  ;;  %v1912_v49 = vmul.f32 0.5, %v1911_v22 }
 0x1c9   : > { %v2099_v41 = vand.u32 2147483648, %v4446_v2  ;;  %v4569_v48 = vadd.s32 4294967184, %v3263_v17  ;;  %v1922_v62 = vmul.f32 %v2899_v53, %v4497_v11  ;;  %2904 = vrsqrt.f32 %v4555_v3 }
 0x1ca   : > { %v4575_v35 = vsel %vm1906_vm2, %v1907_v18, %v1905_v16  ;;  %v2073_v56 = vsel %vm2072_vm3, %v4394_v58, %v2071_v38  ;;  %v2083_v0 = vmul.f32 %v2082_v42, %v4423_v52  ;;  %v1913_v29 = vsub.f32 1.5, %v1912_v49 }
 0x1cb   : > { %2359 = vperm.xlu2 %2831, %v4582_v6   ;;  %v2901_v9 = vpop.eup %2900  ;;  %v2203_v33 = vsel %vm2202_vm0, %v2201_v44, %v2199_v15  ;;  %v2093_v43 = vsub.f32 1.5, %v2092_v28  ;;  %v1923_v63 = vmul.f32 %v2899_v53, %v1922_v62  ;;  %2906 = vrsqrt.f32 %v4565_v40 }
 0x1cc   : > { %v4588_v47 = vsel %vm2206_vm15, %v2205_v25, %v2203_v33  ;;  %vm2096_vm1 = vcmp.eq.f32.partialorder %v4446_v2, inf  ;;  %vm1916_vm6 = vcmp.eq.f32.partialorder %v4448_v55, inf  ;;  %v1919_v27 = vand.u32 2147483648, %v4448_v55 }
 0x1cd   : > { %v2102_v31 = vmul.f32 %v2901_v9, %v4513_v21  ;;  %v2903_v8 = vpop.eup %2902  ;;  %v2209_v51 = vperm.slane %v4575_v35, %v4495_v54  ;;  %v2076_v15 = vsel %vm2074_vm4, %v2075_v50, %v2073_v56  ;;  %v1924_v24 = vmul.f32 0.5, %v1923_v63 }
 0x1ce   : > { %v2085_v20 = vsel %vm2084_vm5, %v4423_v52, %v2083_v0  ;;  %v1914_v57 = vmul.f32 %v2897_v45, %v1913_v29  ;;  %vm1918_vm7 = vcmp.eq.f32.partialorder %v4448_v55, 0.0  ;;  %v2114_v26 = vmul.f32 %v2903_v8, %v4545_v34 }
 0x1cf   : > { %v2103_v18 = vmul.f32 %v2901_v9, %v2102_v31  ;;  %v3025_v4 = vmov 2   ;;  %v2905_v32 = vpop.eup %2904  ;;  %v2094_v39 = vmul.f32 %v4499_v13, %v2093_v43  ;;  %vm2098_vm9 = vcmp.eq.f32.partialorder %v4446_v2, 0.0 }
 0x1d0   : > { %2832 = vset.pattern.permute.xlu0 %v3025_v4  ;;  %v4606_v58 = vadd.s32 4294967176, %v3263_v17  ;;  %v1925_v5 = vsub.f32 1.5, %v1924_v24  ;;  %vm1928_vm10 = vcmp.eq.f32.partialorder %v4497_v11, inf  ;;  %v2241_v30 = vperm.slane %v2076_v15, %v4462_v60 }
 0x1d1   : > { %v2104_v36 = vmul.f32 0.5, %v2103_v18  ;;  %v2115_v45 = vmul.f32 %v2903_v8, %v2114_v26  ;;  %v1590_v1 = vmul.f32 %v2905_v32, %v4555_v3  ;;  %v2907_v50 = vpop.eup %2906  ;;  %v2088_v10 = vsel %vm2086_vm14, %v2087_v46, %v2085_v20 }
 0x1d2   : > { %v1926_v14 = vmul.f32 %v2899_v53, %v1925_v5  ;;  %vm1930_vm12 = vcmp.eq.f32.partialorder %v4497_v11, 0.0  ;;  %v1931_v13 = vand.u32 2147483648, %v4497_v11  ;;  %v1915_v17 = vmul.f32 %v1914_v57, %v4448_v55 }
 0x1d3   : > { %v2105_v59 = vsub.f32 1.5, %v2104_v36  ;;  %v2116_v19 = vmul.f32 0.5, %v2115_v45  ;;  %v1591_v12 = vmul.f32 %v2905_v32, %v1590_v1  ;;  %2833 = vset.pattern.permute.xlu2 %v3025_v4  ;;  %v2095_v60 = vmul.f32 %v2094_v39, %v4446_v2 }
 0x1d4   : > { %v1927_v23 = vmul.f32 %v1926_v14, %v4497_v11  ;;  %vm2108_vm8 = vcmp.eq.f32.partialorder %v4513_v21, inf  ;;  %v1602_v52 = vmul.f32 %v2907_v50, %v4565_v40  ;;  %2369 = vperm.xlu2 %2833, %v4582_v6   ;;  %v2242_v7 = vsel %vm2202_vm0, %v2241_v30, %v2240_v61 }
 0x1d5   : > { %v2106_v38 = vmul.f32 %v2901_v9, %v2105_v59  ;;  %v2117_v42 = vsub.f32 1.5, %v2116_v19  ;;  %v1592_v22 = vmul.f32 0.5, %v1591_v12  ;;  %v2243_v44 = vperm.slane %v2088_v10, %v4488_v37 }
 0x1d6   : > { %vm2110_vm11 = vcmp.eq.f32.partialorder %v4513_v21, 0.0  ;;  %v2111_v16 = vand.u32 2147483648, %v4513_v21  ;;  %v1603_v28 = vmul.f32 %v2907_v50, %v1602_v52  ;;  %v1917_v53 = vsel %vm1916_vm6, %v4448_v55, %v1915_v17 }
 0x1d7   : > { %v2107_v25 = vmul.f32 %v2106_v38, %v4513_v21  ;;  %v2118_v46 = vmul.f32 %v2903_v8, %v2117_v42  ;;  %v1593_v49 = vsub.f32 1.5, %v1592_v22  ;;  %v2097_v61 = vsel %vm2096_vm1, %v4446_v2, %v2095_v60 }
 0x1d8   : > { %v1929_v37 = vsel %vm1928_vm10, %v4497_v11, %v1927_v23  ;;  %vm2120_vm13 = vcmp.eq.f32.partialorder %v4545_v34, inf  ;;  %v1604_v62 = vmul.f32 0.5, %v1603_v28  ;;  %vm2122_vm0 = vcmp.eq.f32.partialorder %v4545_v34, 0.0 }
 0x1d9   : > { %v2109_v56 = vsel %vm2108_vm8, %v4513_v21, %v2107_v25  ;;  %v2119_v0 = vmul.f32 %v2118_v46, %v4545_v34  ;;  %v1594_v29 = vmul.f32 %v2905_v32, %v1593_v49  ;;  %v1920_v9 = vsel %vm1918_vm7, %v1919_v27, %v1917_v53  ;;  %v2296_v46 = vpop.permute.xlu1 %2295 }
 0x1da   : > { %v2123_v33 = vand.u32 2147483648, %v4545_v34  ;;  %vm1596_vm2 = vcmp.eq.f32.partialorder %v4555_v3, inf  ;;  %v1605_v43 = vsub.f32 1.5, %v1604_v62  ;;  %v2100_v63 = vsel %vm2098_vm9, %v2099_v41, %v2097_v61 }
 0x1db   : > { %v1932_v31 = vsel %vm1930_vm12, %v1931_v13, %v1929_v37  ;;  %v1595_v8 = vmul.f32 %v1594_v29, %v4555_v3  ;;  %vm1598_vm3 = vcmp.eq.f32.partialorder %v4555_v3, 0.0  ;;  %v2112_v55 = vsel %vm2110_vm11, %v2111_v16, %v2109_v56  ;;  %v2301_v29 = vpop.permute.xlu2 %2300 }
 0x1dc   : > { %v2121_v27 = vsel %vm2120_vm13, %v4545_v34, %v2119_v0  ;;  %v1599_v15 = vand.u32 2147483648, %v4555_v3  ;;  %v1606_v24 = vmul.f32 %v2907_v50, %v1605_v43  ;;  %v2213_v20 = vperm.slane %v1920_v9, %v4569_v48 }
 0x1dd   : > { %v1597_v2 = vsel %vm1596_vm2, %v4555_v3, %v1595_v8  ;;  %vm1608_vm4 = vcmp.eq.f32.partialorder %v4565_v40, inf  ;;  %vm2210_vm5 = vcmask 917312   ;;  %v2245_v11 = vperm.slane %v2100_v63, %v4495_v54 }
 0x1de   : > { %v2217_v41 = vperm.slane %v1932_v31, %v4606_v58  ;;  %v1607_v57 = vmul.f32 %v1606_v24, %v4565_v40  ;;  %vm2214_vm14 = vcmask 982912   ;;  %v2244_v21 = vsel %vm2206_vm15, %v2243_v44, %v2242_v7 }
 0x1df   : > { %v2247_v18 = vperm.slane %v2112_v55, %v4569_v48  ;;  %v2124_v26 = vsel %vm2122_vm0, %v2123_v33, %v2121_v27  ;;  %vm2218_vm1 = vcmask 1048512   ;;  %v1600_v4 = vsel %vm1598_vm3, %v1599_v15, %v1597_v2  ;;  %v2926_v55 = vld [vmem:[%s3969_s13] sm:$0xf]  ;;  %s3028_s13 = smov 64  }
 0x1e0   : > { %v1611_v32 = vand.u32 2147483648, %v4565_v40  ;;  %v2211_v39 = vsel %vm2210_vm5, %v2209_v51, %v4588_v47  ;;  %v1609_v5 = vsel %vm1608_vm4, %v4565_v40, %v1607_v57  ;;  %vm1610_vm15 = vcmp.eq.f32.partialorder %v4565_v40, 0.0  ;;  %v4681_v19 = vpop.f32.mrf.mxu3 }
 0x1e1   : > { %v2215_v48 = vsel %vm2214_vm14, %v2213_v20, %v2211_v39  ;;  %v2249_v34 = vperm.slane %v2124_v26, %v4606_v58  ;;  %v2246_v36 = vsel %vm2210_vm5, %v2245_v11, %v2244_v21  ;;  %vm2305_vm0 = vcmask 1043456   ;;  %v4690_v21 = vld [vmem:[%s3231_s22] sm:$0x1] }
 0x1e2   : > { %v2219_v30 = vsel %vm2218_vm1, %v2217_v41, %v2215_v48  ;;  %v2248_v45 = vsel %vm2214_vm14, %v2247_v18, %v2246_v36  ;;  %v1612_v1 = vsel %vm1610_vm15, %v1611_v32, %v1609_v5  ;;  %v3026_v31 = vmov 3  }
 0x1e3   : > { %v2259_v3 = vmul.f32 %v2219_v30, %v1600_v4  ;;  %v2250_v50 = vsel %vm2218_vm1, %v2249_v34, %v2248_v45  ;;  %2834 = vset.pattern.permute.xlu2 %v3026_v31  ;;  %vm1274_vm2 = vcmask 1040384  }
 0x1e4   : > { %v2260_v14 = vmul.f32 %v2250_v50, %v1612_v1  ;;  %2377 = vperm.xlu2 %2834, %v2926_v55  }
 0x1e5   : > { %v2261_v10 = vadd.f32 1e-08, %v2259_v3 }
 0x1e6   : > { %v2262_v54 = vadd.f32 1e-08, %v2260_v14  ;;  %v1340_v50 = vpop.f32.mrf.mxu0 }
 0x1e7   : > { %2908 = vrcp.f32 %v2261_v10  ;;  %v2274_v23 = vand.u32 2147483648, %v2261_v10  ;;  %vm2268_vm7 = vweird.f32 %v2261_v10  ;;  %v2272_v52 = vand.u32 2147483647, %v2261_v10 }
 0x1e8   : > { %2910 = vrcp.f32 %v2262_v54  ;;  %v2289_v22 = vand.u32 2147483648, %v2262_v54  ;;  %vm2283_vm8 = vweird.f32 %v2262_v54  ;;  %v2287_v44 = vand.u32 2147483647, %v2262_v54 }
 0x1e9   : > { %v4679_v58 = vpop.f32.mrf.mxu2  ;;  %v2275_v42 = vor.u32 1.1754944e-38, %v2274_v23  ;;  %vm2273_vm12 = vcmp.eq.f32.partialorder %v2272_v52, 8.507059e+37 }
 0x1ea   : > { %v2290_v61 = vor.u32 1.1754944e-38, %v2289_v22  ;;  %vm2288_vm13 = vcmp.eq.f32.partialorder %v2287_v44, 8.507059e+37 }
 0x1ec   : > { %2381 = vperm.xlu2 %2834, %v4582_v6   ;;  %v1275_v6 = vsel %vm1274_vm2, %v4690_v21, 0.0 }
 0x1ed   : > { %v2909_v35 = vpop.eup %2908 }
 0x1ee   : > { %v2264_v47 = vmul.f32 %v2909_v35, %v2261_v10  ;;  %v2911_v51 = vpop.eup %2910  ;;  %vm2269_vm6 = vweird.f32 %v2909_v35 }
 0x1ef   : > { %v2279_v40 = vmul.f32 %v2911_v51, %v2262_v54  ;;  %vm2270_vm9 = vmor %vm2268_vm7, %vm2269_vm6  ;;  %vm2284_vm10 = vweird.f32 %v2911_v51 }
 0x1f0   : > { %v2265_v13 = vsub.f32 1.0, %v2264_v47  ;;  %vm2285_vm11 = vmor %vm2283_vm8, %vm2284_vm10 }
 0x1f1   : > { %v2280_v59 = vsub.f32 1.0, %v2279_v40 }
 0x1f2   : > { %v2266_v17 = vmul.f32 %v2909_v35, %v2265_v13 }
 0x1f3   : > { %v2281_v60 = vmul.f32 %v2911_v51, %v2280_v59  ;;  %v1360_v59 = vpop.f32.mrf.mxu1 }
 0x1f4   : > { %v2267_v12 = vadd.f32 %v2909_v35, %v2266_v17 }
 0x1f5   : > { %v2282_v38 = vadd.f32 %v2911_v51, %v2281_v60 }
 0x1f6   : > { %v2271_v7 = vsel %vm2270_vm9, %v2909_v35, %v2267_v12  ;;  %vm2430_vm9 = vcmask 253952  }
 0x1f7   : > { %v2276_v28 = vsel %vm2273_vm12, %v2275_v42, %v2271_v7  ;;  %v2286_v25 = vsel %vm2285_vm11, %v2911_v51, %v2282_v38 }
 0x1f8   : > { %v2291_v62 = vsel %vm2288_vm13, %v2290_v61, %v2286_v25 }
 0x209   : > { %v1577_v49 = vpop.f32.mrf.mxu3 }
 0x20a   : > { %v1506_v16 = vpop.f32.mrf.mxu2  ;;  %v2292_v56 = vmul.f32 %v2291_v62, %v1577_v49  ;;  %v617_v62 = vld [vmem:[%s3249_s12] sm:$0x1] }
 0x20b   : > { %v2277_v53 = vmul.f32 %v2276_v28, %v1506_v16 }
 0x20c   : > { %v2304_v9 = vmul.f32 %v2301_v29, %v2292_v56 }
 0x20d   : > { %v2303_v37 = vmul.f32 %v2296_v46, %v2277_v53 }
 0x20e   : > { %v2309_v33 = vsel %vm2305_vm0, %v2304_v9, -inf }
 0x20f   : > { %v2306_v0 = vsel %vm2305_vm0, %v2303_v37, -inf }
 0x210   : > { %2307 = vmax.xlane.f32.xlu0 %v2306_v0 }
 0x218   : > { %2310 = vmax.xlane.f32.xlu0 %v2309_v33 }
 0x21d   : > { %v2356_v57 = vpop.permute.xlu2 %2355 }
 0x21e   : > { %v2362_v13 = vmul.f32 %v2356_v57, %v1340_v50 }
 0x225   : > { %v2360_v18 = vpop.permute.xlu2 %2359 }
 0x226   : > { %v2363_v42 = vmul.f32 %v2360_v18, %v1360_v59 }
 0x22e   : > { %v2370_v5 = vpop.permute.xlu2 %2369 }
 0x22f   : > { %v2373_v44 = vmul.f32 %v2370_v5, %v4681_v19  ;;  %v584_v19 = vld [vmem:[%s3231_s22 + $0x1] sm:$0x1]  ;;  %s3027_s22 = smov 32  }
 0x231   : > { %v2375_v46 = vadd.f32 %v2373_v44, %v2363_v42 }
 0x23e   : > { %v2378_v54 = vpop.permute.xlu2 %2377 }
 0x246   : > { %v2382_v25 = vpop.permute.xlu2 %2381 }
 0x283   : > { %v2308_v43 = vpop.xlane.xlu0 %2307 }
 0x284   : > { %v2312_v63 = vsub.f32 %v2303_v37, %v2308_v43  ;;  %v1278_v37 = vsel %vm1274_vm2, %v584_v19, 0.0 }
 0x285   : > { %1279 = vadd.xlane.f32.xlu2 %v1278_v37 }
 0x286   : > { %v2314_v8 = vmul.f32 1.442695, %v2312_v63 }
 0x288   : > { %2912 = vpow2.f32 %v2314_v8 }
 0x28b   : > { %v2311_v27 = vpop.xlane.xlu0 %2310 }
 0x28c   : > { %v2313_v15 = vsub.f32 %v2304_v9, %v2311_v27 }
 0x28e   : > { %v2913_v24 = vpop.eup %2912  ;;  %v2316_v20 = vmul.f32 1.442695, %v2313_v15 }
 0x28f   : > { %v2318_v2 = vsel %vm2305_vm0, %v2913_v24, 0.0 }
 0x290   : > { %2914 = vpow2.f32 %v2316_v20  ;;  %2319 = vadd.xlane.f32.xlu0 %v2318_v2 }
 0x296   : > { %v2915_v11 = vpop.eup %2914 }
 0x297   : > { %v2321_v41 = vsel %vm2305_vm0, %v2915_v11, 0.0 }
 0x298   : > { %2322 = vadd.xlane.f32.xlu1 %v2321_v41 }
 0x2a0   : > { %1276 = vadd.xlane.f32.xlu1 %v1275_v6 }
 0x2a4   : > { %2365 = vperm.xlu0 %2832, %v2926_v55  }
 0x2ac   : > { %2835 = vset.pattern.permute.xlu0 %v3026_v31 }
 0x303   : > { %v2320_v26 = vpop.xlane.xlu0 %2319 }
 0x304   : > { %2916 = vrcp.f32 %v2320_v26  ;;  %v2335_v34 = vand.u32 2147483648, %v2320_v26  ;;  %v2333_v36 = vand.u32 2147483647, %v2320_v26  ;;  %vm2329_vm4 = vweird.f32 %v2320_v26 }
 0x306   : > { %v2336_v1 = vor.u32 1.1754944e-38, %v2335_v34  ;;  %vm2334_vm14 = vcmp.eq.f32.partialorder %v2333_v36, 8.507059e+37 }
 0x30a   : > { %v2917_v4 = vpop.eup %2916 }
 0x30b   : > { %v2325_v32 = vmul.f32 %v2917_v4, %v2320_v26  ;;  %v2323_v39 = vpop.xlane.xlu1 %2322  ;;  %vm2330_vm3 = vweird.f32 %v2917_v4 }
 0x30c   : > { %2918 = vrcp.f32 %v2323_v39  ;;  %vm2331_vm5 = vmor %vm2329_vm4, %vm2330_vm3  ;;  %v2350_v17 = vand.u32 2147483648, %v2323_v39  ;;  %v2348_v23 = vand.u32 2147483647, %v2323_v39  ;;  %vm2344_vm15 = vweird.f32 %v2323_v39 }
 0x30d   : > { %v2326_v48 = vsub.f32 1.0, %v2325_v32 }
 0x30e   : > { %v2351_v22 = vor.u32 1.1754944e-38, %v2350_v17  ;;  %vm2349_vm7 = vcmp.eq.f32.partialorder %v2348_v23, 8.507059e+37 }
 0x30f   : > { %v2327_v30 = vmul.f32 %v2917_v4, %v2326_v48 }
 0x311   : > { %v2328_v3 = vadd.f32 %v2917_v4, %v2327_v30 }
 0x312   : > { %v2919_v45 = vpop.eup %2918 }
 0x313   : > { %v2340_v10 = vmul.f32 %v2919_v45, %v2323_v39  ;;  %v2332_v14 = vsel %vm2331_vm5, %v2917_v4, %v2328_v3  ;;  %vm2345_vm1 = vweird.f32 %v2919_v45  ;;  %v1277_v56 = vpop.xlane.xlu1 %1276 }
 0x314   : > { %v2337_v35 = vsel %vm2334_vm14, %v2336_v1, %v2332_v14  ;;  %vm2346_vm6 = vmor %vm2344_vm15, %vm2345_vm1  ;;  %v1281_v0 = vsub.f32 1.0, %v1277_v56 }
 0x315   : > { %v2341_v47 = vsub.f32 1.0, %v2340_v10  ;;  %v2338_v51 = vmul.f32 %v2913_v24, %v2337_v35 }
 0x316   : > { %v2366_v40 = vpop.permute.xlu0 %2365  ;;  %v1283_v29 = vmul.f32 %v1281_v0, %v617_v62 }
 0x317   : > { %v2342_v12 = vmul.f32 %v2919_v45, %v2341_v47  ;;  %v2372_v60 = vmul.f32 %v2366_v40, %v4679_v58  ;;  %v2384_v52 = vmul.f32 %v2378_v54, %v2338_v51 }
 0x318   : > { %v1285_v9 = vadd.f32 %v1283_v29, %v4690_v21 }
 0x319   : > { %v2374_v7 = vadd.f32 %v2372_v60, %v2362_v13  ;;  %v2343_v38 = vadd.f32 %v2919_v45, %v2342_v12 }
 0x31a   : > { %1287 = vst [vmem:[%s4710_s14] sm:$0x1] %v1285_v9 }
 0x31b   : > { %v2347_v16 = vsel %vm2346_vm6, %v2919_v45, %v2343_v38  ;;  %v2386_v28 = vadd.f32 %v2384_v52, %v2374_v7 }
 0x31c   : > { %v2352_v53 = vsel %vm2349_vm7, %v2351_v22, %v2347_v16 }
 0x31d   : > { %v2353_v58 = vmul.f32 %v2915_v11, %v2352_v53  ;;  %2388 = vst [vmem:[%s4699_s16] sm:$0xf] %v2386_v28  ;;  %2406 = vmatmul.f32.vlgmr.msrb.gmra.mxu0 %v2386_v28 }
 0x31f   : > { %v2385_v49 = vmul.f32 %v2382_v25, %v2353_v58 }
 0x321   : > { %v2387_v61 = vadd.f32 %v2385_v49, %v2375_v46 }
 0x323   : > { %2389 = vst [vmem:[%s4699_s16 + $0x4] sm:$0xf] %v2387_v61  ;;  %2426 = vmatmul.f32.vlgmr.msrb.gmra.mxu1 %v2387_v61 }
 0x39a   : > { %v2407_v33 = vpop.f32.mrf.mxu0 }
 0x39b   : > { %2431 = vst.msk [vmem:[%s4716_s24] sm:$0x1] %vm2430_vm9, %v2407_v33  ;;  %2435 = vrot.lane.b32.xlu0 %v2407_v33, %s3027_s22 }
 0x3a0   : > { %v2427_v43 = vpop.f32.mrf.mxu1 }
 0x3a1   : > { %2432 = vst.msk [vmem:[%s4716_s24 + $0x1] sm:$0x1] %vm2430_vm9, %v2427_v43  ;;  %2437 = vrot.lane.b32.xlu1 %v2427_v43, %s3027_s22  ;;  %s2975_s22 = scalar_lea.hbm %s2974_s5, 8 }
 0x3a2   : > { %p2976_p11 = scmp.ne.s32.totalorder %s2974_s5, %s2975_s22  ;;  %p2981_p1 = scmp.lt.s32.totalorder %s2979_s6, %s2975_s22 }
 0x3a3   : > { %2444 = vrot.lane.b32.xlu0 %v2407_v33, %s3028_s13 }
 0x3a4   : > { %p2977_p12 = pnand %p2976_p11, %p3129_p5  ;;  %p2982_p2 = por %p2981_p1, %p2980_p0 }
 0x3a6   : > { %p2978_p13 = pneg %p2977_p12 }
 0x3a8   : > { %p2983_p3 = pnand %p2982_p2, %p2978_p13 }
 0x3a9   : > { %2455 = vrot.lane.b32.xlu1 %v2427_v43, %s3029_s1 }
 0x3ab   : > { %2446 = vrot.lane.b32.xlu0 %v2427_v43, %s3028_s13 }
 0x3ac   : > { %2986 = shalt.err (!%p2983_p3)
}
 0x3ad   : > { %s3030_s0 = smov 4   ;;  %v618_v63 = vld [vmem:[%s3249_s12 + $0x1] sm:$0x1]  ;;  %v1280_v31 = vpop.xlane.xlu2 %1279  ;;  %vm2441_vm10 = vcmask 517377   ;;  %vm2450_vm12 = vcmask 780802   ;;  %vm2459_vm8 = vcmask 1044227  }
 0x3ae   : > { %2781 = dma.vmem_to_hbm [thread:$0]  (%p3129_p5), %s2498_s25, 128, %s2500_s2, %s2473_s4, %s3028_s13, %s3028_s13, %s3030_s0   ;;  %v1282_v8 = vsub.f32 1.0, %v1280_v31 }
 0x3b0   : > { %v1284_v55 = vmul.f32 %v1282_v8, %v618_v63 }
 0x3b2   : > { %v1286_v27 = vadd.f32 %v1284_v55, %v584_v19 }
 0x3b3   : > { %2453 = vrot.lane.b32.xlu0 %v2407_v33, %s3029_s1 }
 0x3b4   : > { %1288 = vst [vmem:[%s4710_s14 + $0x1] sm:$0x1] %v1286_v27 }
 0x40d   : > { %v2436_v15 = vpop.permute.xlu0 %2435 }
 0x40e   : > { %2442 = vst.msk [vmem:[%s4716_s24 - $0x1] sm:$0x2] %vm2441_vm10, %v2436_v15 }
 0x413   : > { %v2438_v24 = vpop.permute.xlu1 %2437 }
 0x414   : > { %2443 = vst.msk [vmem:[%s4716_s24] sm:$0x2] %vm2441_vm10, %v2438_v24 }
 0x415   : > { %v2445_v20 = vpop.permute.xlu0 %2444 }
 0x416   : > { %2451 = vst.msk [vmem:[%s4716_s24 - $0x2] sm:$0x4] %vm2450_vm12, %v2445_v20 }
 0x41b   : > { %v2456_v41 = vpop.permute.xlu1 %2455 }
 0x41d   : > { %v2447_v2 = vpop.permute.xlu0 %2446 }
 0x41e   : > { %2452 = vst.msk [vmem:[%s4716_s24 - $0x1] sm:$0x4] %vm2450_vm12, %v2447_v2 }
 0x41f   : > { %2461 = vst.msk [vmem:[%s4716_s24 - $0x2] sm:$0x8] %vm2459_vm8, %v2456_v41 }
 0x425   : > { %v2454_v11 = vpop.permute.xlu0 %2453 }
 0x426   : > { %2460 = vst.msk [vmem:[%s4716_s24 - $0x3] sm:$0x8] %vm2459_vm8, %v2454_v11 }
 0x427 PF: > { %p2787_p4 = scmp.ge.s32.totalorder %s3021_s20, 2  ;;  %s2534_s1 = sand.u32 1, %s3009_s17  }
 0x428   : > { %s2535_s2 = scalar_lea.sflag [#allocation3], %s2534_s1 }
 0x429   : > { %p2784_p5 = pnand %p2787_p4, %p3133_p6 }
 0x42b   : > { %p2785_p7 = pneg %p2784_p5 }
 0x42d   : > { %3004 = dma.done.wait (%p2785_p7), %s2535_s2, 128  }
 0x42e   : > { %3006 = vsyncadd (%p2785_p7), %s2535_s2, 4294967168  ;;  %p22_p8 = scmp.ge.s32.totalorder %s3116_s23, 4   ;;  %s4794_s17 = smov %s3013_s18 }
 0x42f   : > { %s4795_s18 = smov %s3017_s19  ;;  %s4796_s19 = smov %s3127_s26 }
 0x430   : > { %s4797_s20 = smov %s3116_s23  ;;  %24 = sbr.rel (!%p22_p8) target bundleno = 11 (0xb), region = 144 }
 0x435   :  { %2548 = vsyncpa [#allocation3], 1 }
 0x436   :  { %2550 = vsyncpa [#allocation3 + $0x1], 1 }

</bundles_post_ra>
